<compile_context>
chip_gen: v7x
topology: tpu7x:2x2x1
jax: 0.10.0
libtpu: 0.0.40
codegen_flags: <defaults>
</compile_context>

<pallas_src>
import numpy as np
import jax
import jax.numpy as jnp
from jax.experimental import pallas as pl
from jax.experimental.pallas import tpu as pltpu

BN_EPS = 1e-5
_LANE = 128


# ------------------------------ constant packing -------------------------------

def _build_slab(blocks, row_align):
    """Pack (name, 2-D np.float32 array) blocks into one [R, 128] slab.

    Returns (slab_f32, {name: (row_offset, rows, cols)}).  Every block starts on
    a sublane-tile-aligned row and is left-aligned at lane 0, so in-kernel reads
    are plain static slices.  One slab == one HBM->VMEM DMA at launch.
    """
    offs, rows = {}, 0
    for name, arr in blocks:
        r, c = arr.shape
        assert c <= _LANE, (name, arr.shape)
        start = ((rows + row_align - 1) // row_align) * row_align
        offs[name] = (start, r, c)
        rows = start + r
    total = max(((rows + row_align - 1) // row_align) * row_align, row_align)
    slab = np.zeros((total, _LANE), np.float32)
    for name, arr in blocks:
        o, r, c = offs[name]
        slab[o:o + r, :c] = arr
    return slab, offs


# ----------------------------- fused Pallas kernel ----------------------------

def _make_kernel(plan):
    """Kernel closure: all shapes / slab offsets are static Python ints."""
    layers, head = plan["layers"], plan["head"]

    def kernel(a0_ref, cbf_ref, cf_ref, out_ref):
        def rd_bf(blk):
            o, r, c = blk
            return cbf_ref[o:o + r, 0:c]

        def rd_f32(blk):
            o, r, c = blk
            return cf_ref[o:o + r, 0:c]

        a = a0_ref[...]                                        # [N*Hi, Wi*Ci] f32
        for lyr in layers:
            # -- Conv2d(4x4, s=2, p=1, bias=False): 4 tiny 0/1 gathers + 1 wide dot
            a_bf = a.astype(jnp.bfloat16)
            taps = [
                jnp.dot(rd_bf(rh), a_bf,
                        preferred_element_type=jnp.float32).astype(jnp.bfloat16)
                for rh in lyr["rh"]
            ]
            b = jnp.concatenate(taps, axis=1)                  # [N*Ho, 4*Wi*Ci] bf16
            acc = jnp.dot(b, rd_bf(lyr["nw"]),
                          preferred_element_type=jnp.float32)  # [N*Ho, Wo*Co] f32

            # -- BatchNorm2d (training-mode batch stats, biased var) + ReLU, f32
            fold = rd_f32(lyr["fold"])                         # [Wo*Co, Co]
            expm = rd_f32(lyr["exp"])                          # [Co, Wo*Co]
            gb = rd_f32(lyr["gb"])                             # [2, Co] = (gamma; beta)
            s12 = jnp.dot(
                jnp.concatenate([jnp.sum(acc, axis=0, keepdims=True),
                                 jnp.sum(acc * acc, axis=0, keepdims=True)],
                                axis=0),
                fold, preferred_element_type=jnp.float32)      # [2, Co]
            inv_cnt = 1.0 / float(lyr["cnt"])
            mean = s12[0:1, :] * inv_cnt
            var = jnp.maximum(s12[1:2, :] * inv_cnt - mean * mean, 0.0)
            scale = gb[0:1, :] * jax.lax.rsqrt(var + BN_EPS)
            shift = gb[1:2, :] - mean * scale
            ss = jnp.concatenate([scale, shift], axis=0)       # [2, Co]
            ss_l = jnp.dot(ss, expm,
                           preferred_element_type=jnp.float32)  # [2, Wo*Co]
            a = jnp.maximum(acc * ss_l[0:1, :] + ss_l[1:2, :], 0.0)

        # -- AdaptiveAvgPool2d(1) + Linear, folded into head_w on the host -------
        y = jnp.dot(a.astype(jnp.bfloat16), rd_bf(head["w"]),
                    preferred_element_type=jnp.float32)        # [N*H_last, classes]
        if head["rp"] is not None:                             # only when H_last > 1
            y = jnp.dot(rd_f32(head["rp"]), y, preferred_element_type=jnp.float32)
        out_ref[...] = y + rd_f32(head["b"])

    return kernel


# ------------------------------ parameter setup -------------------------------

def init_params(key, num_classes=10):
    """Raw parameters in PyTorch layouts (Conv2d: [Co,Ci,kh,kw]; Linear: [out,in])."""
    chans = [(2, 8), (8, 32), (32, 64), (64, 64)]
    keys = jax.random.split(key, len(chans) * 3 + 2)
    convs = []
    ki = 0
    for (cin, cout) in chans:
        w = 0.05 * jax.random.normal(keys[ki], (cout, cin, 4, 4), jnp.float32); ki += 1
        g = 1.0 + 0.1 * jax.random.normal(keys[ki], (cout,), jnp.float32); ki += 1
        b = 0.1 * jax.random.normal(keys[ki], (cout,), jnp.float32); ki += 1
        convs.append((w, g, b))
    lw = 0.05 * jax.random.normal(keys[ki], (num_classes, 64), jnp.float32); ki += 1
    lb = 0.05 * jax.random.normal(keys[ki], (num_classes,), jnp.float32)
    return {"convs": convs, "linear_w": lw, "linear_b": lb}


def prepare_params(raw, batch_size, in_hw):
    """Build (once, on host) the two packed constant slabs + the static plan."""
    n = batch_size
    bf_blocks, f32_blocks, layer_plans = [], [], []
    hi = wi = in_hw
    ci = raw["convs"][0][0].shape[1]
    fold_last = None

    for li, (wgt, gamma, beta) in enumerate(raw["convs"]):
        wnp = np.asarray(wgt, np.float32)                       # [Co, Ci, 4, 4]
        co = wnp.shape[0]
        ho, wo = hi // 2, wi // 2

        # Stride-2 height gather (+ zero pad) per tap; block-diagonal over batch.
        rh_names = []
        for i in range(4):
            rh = np.zeros((n * ho, n * hi), np.float32)
            for bi in range(n):
                for oh in range(ho):
                    h = 2 * oh + i - 1
                    if 0 <= h < hi:
                        rh[bi * ho + oh, bi * hi + h] = 1.0
            name = f"rh{li}_{i}"
            bf_blocks.append((name, rh))
            rh_names.append(name)

        # Vertically stacked width conv-as-matmul (all 4 taps, weights baked in):
        #   nw[i*Wi*Ci + w*Ci + c, ow*Co + co] = W[co, c, i, w - 2*ow + 1]
        nw = np.zeros((4 * wi * ci, wo * co), np.float32)
        for i in range(4):
            base = i * wi * ci
            for ow in range(wo):
                for j in range(4):
                    w = 2 * ow + j - 1
                    if 0 <= w < wi:
                        nw[base + w * ci: base + (w + 1) * ci,
                           ow * co:(ow + 1) * co] = wnp[:, :, i, j].T
        bf_blocks.append((f"nw{li}", nw))

        fold = np.tile(np.eye(co, dtype=np.float32), (wo, 1))   # [Wo*Co, Co]
        f32_blocks.append((f"fold{li}", fold))
        f32_blocks.append((f"exp{li}", fold.T.copy()))          # [Co, Wo*Co]
        gb = np.stack([np.asarray(gamma, np.float32),
                       np.asarray(beta, np.float32)], axis=0)   # [2, Co]
        f32_blocks.append((f"gb{li}", gb))

        layer_plans.append(dict(rh=rh_names, nw=f"nw{li}", fold=f"fold{li}",
                                exp=f"exp{li}", gb=f"gb{li}", cnt=n * ho * wo))
        fold_last = fold
        ci, hi, wi = co, ho, wo

    # Folded head: AdaptiveAvgPool2d(1) + Linear  ->  one matmul + bias.
    lin_w = np.asarray(raw["linear_w"], np.float32)             # [nc, C_last]
    lin_b = np.asarray(raw["linear_b"], np.float32)
    nc = lin_w.shape[0]
    head_w = fold_last @ lin_w.T / float(hi * wi)               # [W_last*C_last, nc]
    bf_blocks.append(("head_w", head_w))
    f32_blocks.append(("lin_b", lin_b.reshape(1, nc)))
    rp_name = None
    if hi > 1:                                                  # H_last > 1 only
        rp = np.zeros((n, n * hi), np.float32)
        for bi in range(n):
            rp[bi, bi * hi:(bi + 1) * hi] = 1.0
        f32_blocks.append(("rp", rp))
        rp_name = "rp"

    bf_slab, bf_off = _build_slab(bf_blocks, row_align=16)      # bf16 (16,128) tiles
    f32_slab, f32_off = _build_slab(f32_blocks, row_align=8)    # f32  (8,128)  tiles

    plan_layers = [dict(rh=[bf_off[nm] for nm in lp["rh"]],
                        nw=bf_off[lp["nw"]],
                        fold=f32_off[lp["fold"]],
                        exp=f32_off[lp["exp"]],
                        gb=f32_off[lp["gb"]],
                        cnt=lp["cnt"]) for lp in layer_plans]
    head = dict(w=bf_off["head_w"], b=f32_off["lin_b"],
                rp=(f32_off[rp_name] if rp_name is not None else None))

    return dict(plan=dict(layers=plan_layers, head=head),
                const_bf16=jnp.asarray(bf_slab, dtype=jnp.bfloat16),
                const_f32=jnp.asarray(f32_slab, dtype=jnp.float32),
                num_classes=nc)


# --------------------------------- forward ------------------------------------

def dcgan_discriminator_forward(x_nchw, prep):
    """x_nchw: [N, 2, H, W] float32. Returns logits [N, num_classes]."""
    n, c, h, w = x_nchw.shape
    # TODO(synk): this 2 KB NCHW -> [(n,h),(w,c)] relayout could also be baked
    # into the layer-1 constants; kept as one tiny fused XLA transpose.
    a0 = jnp.transpose(x_nchw, (0, 2, 3, 1)).reshape(n * h, w * c)

    vmem = pl.BlockSpec(memory_space=pltpu.MemorySpace.VMEM)
    return pl.pallas_call(
        _make_kernel(prep["plan"]),
        out_shape=jax.ShapeDtypeStruct((n, prep["num_classes"]), jnp.float32),
        in_specs=[vmem, vmem, vmem],
        out_specs=vmem,
    )(a0, prep["const_bf16"], prep["const_f32"])


# ---------------------------- plain-JAX reference ------------------------------

def reference_forward(x_nchw, raw):
    x = jnp.transpose(x_nchw, (0, 2, 3, 1))
    for (w, g, b) in raw["convs"]:
        y = jax.lax.conv_general_dilated(
            x, jnp.transpose(w, (2, 3, 1, 0)), window_strides=(2, 2),
            padding=((1, 1), (1, 1)), dimension_numbers=("NHWC", "HWIO", "NHWC"),
            precision=jax.lax.Precision.HIGHEST)
        mean = jnp.mean(y, axis=(0, 1, 2), keepdims=True)
        var = jnp.mean(jnp.square(y - mean), axis=(0, 1, 2), keepdims=True)
        y = (y - mean) * jax.lax.rsqrt(var + BN_EPS) * g.reshape(1, 1, 1, -1) \
            + b.reshape(1, 1, 1, -1)
        x = jnp.maximum(y, 0.0)
    pooled = jnp.mean(x, axis=(1, 2))
    return pooled @ raw["linear_w"].T + raw["linear_b"].reshape(1, -1)


# ----------------------------------- main --------------------------------------

if __name__ == "__main__":
    key = jax.random.PRNGKey(0)
    pkey, xkey = jax.random.split(key)
    raw = init_params(pkey, num_classes=10)

    # Input: batch=2, in_channels=2 (per module __init__), spatial 16x16
    # (16 -> 8 -> 4 -> 2 -> 1 across the four stride-2 convs).
    x = jax.random.normal(xkey, (2, 2, 16, 16), jnp.float32)

    prep = prepare_params(raw, batch_size=x.shape[0], in_hw=x.shape[2])

    fwd = jax.jit(lambda xx: dcgan_discriminator_forward(xx, prep))
    logits = jax.block_until_ready(fwd(x))

    assert logits.shape == (2, 10), logits.shape
    assert logits.dtype == jnp.float32
    assert bool(jnp.all(jnp.isfinite(logits)))

    # Semantic check against a plain-JAX reference of the PyTorch module
    # (training-mode BatchNorm batch statistics, biased variance, eps=1e-5).
    ref = reference_forward(x, raw)
    max_err = float(jnp.max(jnp.abs(logits - ref)))
    assert bool(jnp.allclose(logits, ref, rtol=5e-2, atol=5e-2)), (max_err, logits, ref)

    print("KERNEL_OK")
</pallas_src>

<mosaic_0001>
module attributes {stable_mosaic.version = 11 : i64} {
  func.func @kernel(%arg0: memref<32x32xf32, #tpu.memory_space<vmem>>, %arg1: memref<1728x128xbf16, #tpu.memory_space<vmem>>, %arg2: memref<592x128xf32, #tpu.memory_space<vmem>>, %arg3: memref<2x10xf32, #tpu.memory_space<vmem>>) attributes {dimension_semantics = [], scalar_prefetch = 0 : i64, scratch_operands = 0 : i64, tpu.core_type = #tpu.core_type<tc>} {
    %c0 = arith.constant 0 : index
    %c0_0 = arith.constant 0 : index
    %0 = vector.load %arg0[%c0, %c0_0] : memref<32x32xf32, #tpu.memory_space<vmem>>, vector<32x32xf32>
    %1 = arith.truncf %0 : vector<32x32xf32> to vector<32x32xbf16>
    %c0_1 = arith.constant 0 : index
    %c0_2 = arith.constant 0 : index
    %2 = vector.load %arg1[%c0_1, %c0_2] : memref<1728x128xbf16, #tpu.memory_space<vmem>>, vector<16x32xbf16>
    %cst = arith.constant dense<0.000000e+00> : vector<16x32xf32>
    %3 = tpu.matmul %2, %1, %cst {dimension_numbers = #tpu.dot_dimension_numbers<[1], [0], [0], [1], [0, 0, 1, 1], [], []>} : vector<16x32xbf16>, vector<32x32xbf16>, vector<16x32xf32> -> vector<16x32xf32>
    %4 = arith.truncf %3 : vector<16x32xf32> to vector<16x32xbf16>
    %c16 = arith.constant 16 : index
    %c0_3 = arith.constant 0 : index
    %5 = vector.load %arg1[%c16, %c0_3] : memref<1728x128xbf16, #tpu.memory_space<vmem>>, vector<16x32xbf16>
    %cst_4 = arith.constant dense<0.000000e+00> : vector<16x32xf32>
    %6 = tpu.matmul %5, %1, %cst_4 {dimension_numbers = #tpu.dot_dimension_numbers<[1], [0], [0], [1], [0, 0, 1, 1], [], []>} : vector<16x32xbf16>, vector<32x32xbf16>, vector<16x32xf32> -> vector<16x32xf32>
    %7 = arith.truncf %6 : vector<16x32xf32> to vector<16x32xbf16>
    %c32 = arith.constant 32 : index
    %c0_5 = arith.constant 0 : index
    %8 = vector.load %arg1[%c32, %c0_5] : memref<1728x128xbf16, #tpu.memory_space<vmem>>, vector<16x32xbf16>
    %cst_6 = arith.constant dense<0.000000e+00> : vector<16x32xf32>
    %9 = tpu.matmul %8, %1, %cst_6 {dimension_numbers = #tpu.dot_dimension_numbers<[1], [0], [0], [1], [0, 0, 1, 1], [], []>} : vector<16x32xbf16>, vector<32x32xbf16>, vector<16x32xf32> -> vector<16x32xf32>
    %10 = arith.truncf %9 : vector<16x32xf32> to vector<16x32xbf16>
    %c48 = arith.constant 48 : index
    %c0_7 = arith.constant 0 : index
    %11 = vector.load %arg1[%c48, %c0_7] : memref<1728x128xbf16, #tpu.memory_space<vmem>>, vector<16x32xbf16>
    %cst_8 = arith.constant dense<0.000000e+00> : vector<16x32xf32>
    %12 = tpu.matmul %11, %1, %cst_8 {dimension_numbers = #tpu.dot_dimension_numbers<[1], [0], [0], [1], [0, 0, 1, 1], [], []>} : vector<16x32xbf16>, vector<32x32xbf16>, vector<16x32xf32> -> vector<16x32xf32>
    %13 = arith.truncf %12 : vector<16x32xf32> to vector<16x32xbf16>
    %14 = tpu.concatenate %4, %7, %10, %13 in 1 : vector<16x32xbf16>, vector<16x32xbf16>, vector<16x32xbf16>, vector<16x32xbf16> -> vector<16x128xbf16>
    %c64 = arith.constant 64 : index
    %c0_9 = arith.constant 0 : index
    %15 = vector.load %arg1[%c64, %c0_9] : memref<1728x128xbf16, #tpu.memory_space<vmem>>, vector<128x64xbf16>
    %cst_10 = arith.constant dense<0.000000e+00> : vector<16x64xf32>
    %16 = tpu.matmul %14, %15, %cst_10 {dimension_numbers = #tpu.dot_dimension_numbers<[1], [0], [0], [1], [0, 0, 1, 1], [], []>} : vector<16x128xbf16>, vector<128x64xbf16>, vector<16x64xf32> -> vector<16x64xf32>
    %c0_11 = arith.constant 0 : index
    %c0_12 = arith.constant 0 : index
    %17 = vector.load %arg2[%c0_11, %c0_12] : memref<592x128xf32, #tpu.memory_space<vmem>>, vector<64x8xf32>
    %c64_13 = arith.constant 64 : index
    %c0_14 = arith.constant 0 : index
    %18 = vector.load %arg2[%c64_13, %c0_14] : memref<592x128xf32, #tpu.memory_space<vmem>>, vector<8x64xf32>
    %c72 = arith.constant 72 : index
    %c0_15 = arith.constant 0 : index
    %19 = vector.load %arg2[%c72, %c0_15] : memref<592x128xf32, #tpu.memory_space<vmem>>, vector<2x8xf32>
    %cst_16 = arith.constant dense<0.000000e+00> : vector<64xf32>
    %20 = vector.multi_reduction <add>, %16, %cst_16 [0] : vector<16x64xf32> to vector<64xf32>
    %21 = vector.shape_cast %20 : vector<64xf32> to vector<1x64xf32>
    %22 = arith.mulf %16, %16 : vector<16x64xf32>
    %cst_17 = arith.constant dense<0.000000e+00> : vector<64xf32>
    %23 = vector.multi_reduction <add>, %22, %cst_17 [0] : vector<16x64xf32> to vector<64xf32>
    %24 = vector.shape_cast %23 : vector<64xf32> to vector<1x64xf32>
    %25 = tpu.concatenate %21, %24 in 0 : vector<1x64xf32>, vector<1x64xf32> -> vector<2x64xf32>
    %cst_18 = arith.constant dense<0.000000e+00> : vector<2x8xf32>
    %26 = tpu.matmul %25, %17, %cst_18 {dimension_numbers = #tpu.dot_dimension_numbers<[1], [0], [0], [1], [0, 0, 1, 1], [], []>} : vector<2x64xf32>, vector<64x8xf32>, vector<2x8xf32> -> vector<2x8xf32>
    %27 = vector.extract_strided_slice %26 {offsets = [0, 0], sizes = [1, 8], strides = [1, 1]} : vector<2x8xf32> to vector<1x8xf32>
    %cst_19 = arith.constant 7.812500e-03 : f32
    %28 = vector.broadcast %cst_19 : f32 to vector<1x8xf32>
    %29 = arith.mulf %27, %28 : vector<1x8xf32>
    %30 = vector.extract_strided_slice %26 {offsets = [1, 0], sizes = [1, 8], strides = [1, 1]} : vector<2x8xf32> to vector<1x8xf32>
    %cst_20 = arith.constant 7.812500e-03 : f32
    %31 = vector.broadcast %cst_20 : f32 to vector<1x8xf32>
    %32 = arith.mulf %30, %31 : vector<1x8xf32>
    %33 = arith.mulf %29, %29 : vector<1x8xf32>
    %34 = arith.subf %32, %33 : vector<1x8xf32>
    %cst_21 = arith.constant 0.000000e+00 : f32
    %35 = vector.broadcast %cst_21 : f32 to vector<1x8xf32>
    %36 = arith.maximumf %34, %35 : vector<1x8xf32>
    %37 = vector.extract_strided_slice %19 {offsets = [0, 0], sizes = [1, 8], strides = [1, 1]} : vector<2x8xf32> to vector<1x8xf32>
    %cst_22 = arith.constant 9.99999974E-6 : f32
    %38 = vector.broadcast %cst_22 : f32 to vector<1x8xf32>
    %39 = arith.addf %36, %38 : vector<1x8xf32>
    %40 = math.rsqrt %39 : vector<1x8xf32>
    %41 = arith.mulf %37, %40 : vector<1x8xf32>
    %42 = vector.extract_strided_slice %19 {offsets = [1, 0], sizes = [1, 8], strides = [1, 1]} : vector<2x8xf32> to vector<1x8xf32>
    %43 = arith.mulf %29, %41 : vector<1x8xf32>
    %44 = arith.subf %42, %43 : vector<1x8xf32>
    %45 = tpu.concatenate %41, %44 in 0 : vector<1x8xf32>, vector<1x8xf32> -> vector<2x8xf32>
    %cst_23 = arith.constant dense<0.000000e+00> : vector<2x64xf32>
    %46 = tpu.matmul %45, %18, %cst_23 {dimension_numbers = #tpu.dot_dimension_numbers<[1], [0], [0], [1], [0, 0, 1, 1], [], []>} : vector<2x8xf32>, vector<8x64xf32>, vector<2x64xf32> -> vector<2x64xf32>
    %47 = vector.extract_strided_slice %46 {offsets = [0, 0], sizes = [1, 64], strides = [1, 1]} : vector<2x64xf32> to vector<1x64xf32>
    %48 = vector.broadcast %47 : vector<1x64xf32> to vector<16x64xf32>
    %49 = arith.mulf %16, %48 : vector<16x64xf32>
    %50 = vector.extract_strided_slice %46 {offsets = [1, 0], sizes = [1, 64], strides = [1, 1]} : vector<2x64xf32> to vector<1x64xf32>
    %51 = vector.broadcast %50 : vector<1x64xf32> to vector<16x64xf32>
    %52 = arith.addf %49, %51 : vector<16x64xf32>
    %cst_24 = arith.constant 0.000000e+00 : f32
    %53 = vector.broadcast %cst_24 : f32 to vector<16x64xf32>
    %54 = arith.maximumf %52, %53 : vector<16x64xf32>
    %55 = arith.truncf %54 : vector<16x64xf32> to vector<16x64xbf16>
    %c192 = arith.constant 192 : index
    %c0_25 = arith.constant 0 : index
    %56 = vector.load %arg1[%c192, %c0_25] : memref<1728x128xbf16, #tpu.memory_space<vmem>>, vector<8x16xbf16>
    %cst_26 = arith.constant dense<0.000000e+00> : vector<8x64xf32>
    %57 = tpu.matmul %56, %55, %cst_26 {dimension_numbers = #tpu.dot_dimension_numbers<[1], [0], [0], [1], [0, 0, 1, 1], [], []>} : vector<8x16xbf16>, vector<16x64xbf16>, vector<8x64xf32> -> vector<8x64xf32>
    %58 = arith.truncf %57 : vector<8x64xf32> to vector<8x64xbf16>
    %c208 = arith.constant 208 : index
    %c0_27 = arith.constant 0 : index
    %59 = vector.load %arg1[%c208, %c0_27] : memref<1728x128xbf16, #tpu.memory_space<vmem>>, vector<8x16xbf16>
    %cst_28 = arith.constant dense<0.000000e+00> : vector<8x64xf32>
    %60 = tpu.matmul %59, %55, %cst_28 {dimension_numbers = #tpu.dot_dimension_numbers<[1], [0], [0], [1], [0, 0, 1, 1], [], []>} : vector<8x16xbf16>, vector<16x64xbf16>, vector<8x64xf32> -> vector<8x64xf32>
    %61 = arith.truncf %60 : vector<8x64xf32> to vector<8x64xbf16>
    %c224 = arith.constant 224 : index
    %c0_29 = arith.constant 0 : index
    %62 = vector.load %arg1[%c224, %c0_29] : memref<1728x128xbf16, #tpu.memory_space<vmem>>, vector<8x16xbf16>
    %cst_30 = arith.constant dense<0.000000e+00> : vector<8x64xf32>
    %63 = tpu.matmul %62, %55, %cst_30 {dimension_numbers = #tpu.dot_dimension_numbers<[1], [0], [0], [1], [0, 0, 1, 1], [], []>} : vector<8x16xbf16>, vector<16x64xbf16>, vector<8x64xf32> -> vector<8x64xf32>
    %64 = arith.truncf %63 : vector<8x64xf32> to vector<8x64xbf16>
    %c240 = arith.constant 240 : index
    %c0_31 = arith.constant 0 : index
    %65 = vector.load %arg1[%c240, %c0_31] : memref<1728x128xbf16, #tpu.memory_space<vmem>>, vector<8x16xbf16>
    %cst_32 = arith.constant dense<0.000000e+00> : vector<8x64xf32>
    %66 = tpu.matmul %65, %55, %cst_32 {dimension_numbers = #tpu.dot_dimension_numbers<[1], [0], [0], [1], [0, 0, 1, 1], [], []>} : vector<8x16xbf16>, vector<16x64xbf16>, vector<8x64xf32> -> vector<8x64xf32>
    %67 = arith.truncf %66 : vector<8x64xf32> to vector<8x64xbf16>
    %68 = tpu.concatenate %58, %61, %64, %67 in 1 : vector<8x64xbf16>, vector<8x64xbf16>, vector<8x64xbf16>, vector<8x64xbf16> -> vector<8x256xbf16>
    %c256 = arith.constant 256 : index
    %c0_33 = arith.constant 0 : index
    %69 = vector.load %arg1[%c256, %c0_33] : memref<1728x128xbf16, #tpu.memory_space<vmem>>, vector<256x128xbf16>
    %cst_34 = arith.constant dense<0.000000e+00> : vector<8x128xf32>
    %70 = tpu.matmul %68, %69, %cst_34 {dimension_numbers = #tpu.dot_dimension_numbers<[1], [0], [0], [1], [0, 0, 1, 1], [], []>} : vector<8x256xbf16>, vector<256x128xbf16>, vector<8x128xf32> -> vector<8x128xf32>
    %c80 = arith.constant 80 : index
    %c0_35 = arith.constant 0 : index
    %71 = vector.load %arg2[%c80, %c0_35] : memref<592x128xf32, #tpu.memory_space<vmem>>, vector<128x32xf32>
    %c208_36 = arith.constant 208 : index
    %c0_37 = arith.constant 0 : index
    %72 = vector.load %arg2[%c208_36, %c0_37] : memref<592x128xf32, #tpu.memory_space<vmem>>, vector<32x128xf32>
    %c240_38 = arith.constant 240 : index
    %c0_39 = arith.constant 0 : index
    %73 = vector.load %arg2[%c240_38, %c0_39] : memref<592x128xf32, #tpu.memory_space<vmem>>, vector<2x32xf32>
    %cst_40 = arith.constant dense<0.000000e+00> : vector<128xf32>
    %74 = vector.multi_reduction <add>, %70, %cst_40 [0] : vector<8x128xf32> to vector<128xf32>
    %75 = vector.shape_cast %74 : vector<128xf32> to vector<1x128xf32>
    %76 = arith.mulf %70, %70 : vector<8x128xf32>
    %cst_41 = arith.constant dense<0.000000e+00> : vector<128xf32>
    %77 = vector.multi_reduction <add>, %76, %cst_41 [0] : vector<8x128xf32> to vector<128xf32>
    %78 = vector.shape_cast %77 : vector<128xf32> to vector<1x128xf32>
    %79 = tpu.concatenate %75, %78 in 0 : vector<1x128xf32>, vector<1x128xf32> -> vector<2x128xf32>
    %cst_42 = arith.constant dense<0.000000e+00> : vector<2x32xf32>
    %80 = tpu.matmul %79, %71, %cst_42 {dimension_numbers = #tpu.dot_dimension_numbers<[1], [0], [0], [1], [0, 0, 1, 1], [], []>} : vector<2x128xf32>, vector<128x32xf32>, vector<2x32xf32> -> vector<2x32xf32>
    %81 = vector.extract_strided_slice %80 {offsets = [0, 0], sizes = [1, 32], strides = [1, 1]} : vector<2x32xf32> to vector<1x32xf32>
    %cst_43 = arith.constant 3.125000e-02 : f32
    %82 = vector.broadcast %cst_43 : f32 to vector<1x32xf32>
    %83 = arith.mulf %81, %82 : vector<1x32xf32>
    %84 = vector.extract_strided_slice %80 {offsets = [1, 0], sizes = [1, 32], strides = [1, 1]} : vector<2x32xf32> to vector<1x32xf32>
    %cst_44 = arith.constant 3.125000e-02 : f32
    %85 = vector.broadcast %cst_44 : f32 to vector<1x32xf32>
    %86 = arith.mulf %84, %85 : vector<1x32xf32>
    %87 = arith.mulf %83, %83 : vector<1x32xf32>
    %88 = arith.subf %86, %87 : vector<1x32xf32>
    %cst_45 = arith.constant 0.000000e+00 : f32
    %89 = vector.broadcast %cst_45 : f32 to vector<1x32xf32>
    %90 = arith.maximumf %88, %89 : vector<1x32xf32>
    %91 = vector.extract_strided_slice %73 {offsets = [0, 0], sizes = [1, 32], strides = [1, 1]} : vector<2x32xf32> to vector<1x32xf32>
    %cst_46 = arith.constant 9.99999974E-6 : f32
    %92 = vector.broadcast %cst_46 : f32 to vector<1x32xf32>
    %93 = arith.addf %90, %92 : vector<1x32xf32>
    %94 = math.rsqrt %93 : vector<1x32xf32>
    %95 = arith.mulf %91, %94 : vector<1x32xf32>
    %96 = vector.extract_strided_slice %73 {offsets = [1, 0], sizes = [1, 32], strides = [1, 1]} : vector<2x32xf32> to vector<1x32xf32>
    %97 = arith.mulf %83, %95 : vector<1x32xf32>
    %98 = arith.subf %96, %97 : vector<1x32xf32>
    %99 = tpu.concatenate %95, %98 in 0 : vector<1x32xf32>, vector<1x32xf32> -> vector<2x32xf32>
    %cst_47 = arith.constant dense<0.000000e+00> : vector<2x128xf32>
    %100 = tpu.matmul %99, %72, %cst_47 {dimension_numbers = #tpu.dot_dimension_numbers<[1], [0], [0], [1], [0, 0, 1, 1], [], []>} : vector<2x32xf32>, vector<32x128xf32>, vector<2x128xf32> -> vector<2x128xf32>
    %101 = vector.extract_strided_slice %100 {offsets = [0, 0], sizes = [1, 128], strides = [1, 1]} : vector<2x128xf32> to vector<1x128xf32>
    %102 = vector.broadcast %101 : vector<1x128xf32> to vector<8x128xf32>
    %103 = arith.mulf %70, %102 : vector<8x128xf32>
    %104 = vector.extract_strided_slice %100 {offsets = [1, 0], sizes = [1, 128], strides = [1, 1]} : vector<2x128xf32> to vector<1x128xf32>
    %105 = vector.broadcast %104 : vector<1x128xf32> to vector<8x128xf32>
    %106 = arith.addf %103, %105 : vector<8x128xf32>
    %cst_48 = arith.constant 0.000000e+00 : f32
    %107 = vector.broadcast %cst_48 : f32 to vector<8x128xf32>
    %108 = arith.maximumf %106, %107 : vector<8x128xf32>
    %109 = arith.truncf %108 : vector<8x128xf32> to vector<8x128xbf16>
    %c512 = arith.constant 512 : index
    %c0_49 = arith.constant 0 : index
    %110 = vector.load %arg1[%c512, %c0_49] : memref<1728x128xbf16, #tpu.memory_space<vmem>>, vector<4x8xbf16>
    %cst_50 = arith.constant dense<0.000000e+00> : vector<4x128xf32>
    %111 = tpu.matmul %110, %109, %cst_50 {dimension_numbers = #tpu.dot_dimension_numbers<[1], [0], [0], [1], [0, 0, 1, 1], [], []>} : vector<4x8xbf16>, vector<8x128xbf16>, vector<4x128xf32> -> vector<4x128xf32>
    %112 = arith.truncf %111 : vector<4x128xf32> to vector<4x128xbf16>
    %c528 = arith.constant 528 : index
    %c0_51 = arith.constant 0 : index
    %113 = vector.load %arg1[%c528, %c0_51] : memref<1728x128xbf16, #tpu.memory_space<vmem>>, vector<4x8xbf16>
    %cst_52 = arith.constant dense<0.000000e+00> : vector<4x128xf32>
    %114 = tpu.matmul %113, %109, %cst_52 {dimension_numbers = #tpu.dot_dimension_numbers<[1], [0], [0], [1], [0, 0, 1, 1], [], []>} : vector<4x8xbf16>, vector<8x128xbf16>, vector<4x128xf32> -> vector<4x128xf32>
    %115 = arith.truncf %114 : vector<4x128xf32> to vector<4x128xbf16>
    %c544 = arith.constant 544 : index
    %c0_53 = arith.constant 0 : index
    %116 = vector.load %arg1[%c544, %c0_53] : memref<1728x128xbf16, #tpu.memory_space<vmem>>, vector<4x8xbf16>
    %cst_54 = arith.constant dense<0.000000e+00> : vector<4x128xf32>
    %117 = tpu.matmul %116, %109, %cst_54 {dimension_numbers = #tpu.dot_dimension_numbers<[1], [0], [0], [1], [0, 0, 1, 1], [], []>} : vector<4x8xbf16>, vector<8x128xbf16>, vector<4x128xf32> -> vector<4x128xf32>
    %118 = arith.truncf %117 : vector<4x128xf32> to vector<4x128xbf16>
    %c560 = arith.constant 560 : index
    %c0_55 = arith.constant 0 : index
    %119 = vector.load %arg1[%c560, %c0_55] : memref<1728x128xbf16, #tpu.memory_space<vmem>>, vector<4x8xbf16>
    %cst_56 = arith.constant dense<0.000000e+00> : vector<4x128xf32>
    %120 = tpu.matmul %119, %109, %cst_56 {dimension_numbers = #tpu.dot_dimension_numbers<[1], [0], [0], [1], [0, 0, 1, 1], [], []>} : vector<4x8xbf16>, vector<8x128xbf16>, vector<4x128xf32> -> vector<4x128xf32>
    %121 = arith.truncf %120 : vector<4x128xf32> to vector<4x128xbf16>
    %122 = tpu.concatenate %112, %115, %118, %121 in 1 : vector<4x128xbf16>, vector<4x128xbf16>, vector<4x128xbf16>, vector<4x128xbf16> -> vector<4x512xbf16>
    %c576 = arith.constant 576 : index
    %c0_57 = arith.constant 0 : index
    %123 = vector.load %arg1[%c576, %c0_57] : memref<1728x128xbf16, #tpu.memory_space<vmem>>, vector<512x128xbf16>
    %cst_58 = arith.constant dense<0.000000e+00> : vector<4x128xf32>
    %124 = tpu.matmul %122, %123, %cst_58 {dimension_numbers = #tpu.dot_dimension_numbers<[1], [0], [0], [1], [0, 0, 1, 1], [], []>} : vector<4x512xbf16>, vector<512x128xbf16>, vector<4x128xf32> -> vector<4x128xf32>
    %c248 = arith.constant 248 : index
    %c0_59 = arith.constant 0 : index
    %125 = vector.load %arg2[%c248, %c0_59] : memref<592x128xf32, #tpu.memory_space<vmem>>, vector<128x64xf32>
    %c376 = arith.constant 376 : index
    %c0_60 = arith.constant 0 : index
    %126 = vector.load %arg2[%c376, %c0_60] : memref<592x128xf32, #tpu.memory_space<vmem>>, vector<64x128xf32>
    %c440 = arith.constant 440 : index
    %c0_61 = arith.constant 0 : index
    %127 = vector.load %arg2[%c440, %c0_61] : memref<592x128xf32, #tpu.memory_space<vmem>>, vector<2x64xf32>
    %cst_62 = arith.constant dense<0.000000e+00> : vector<128xf32>
    %128 = vector.multi_reduction <add>, %124, %cst_62 [0] : vector<4x128xf32> to vector<128xf32>
    %129 = vector.shape_cast %128 : vector<128xf32> to vector<1x128xf32>
    %130 = arith.mulf %124, %124 : vector<4x128xf32>
    %cst_63 = arith.constant dense<0.000000e+00> : vector<128xf32>
    %131 = vector.multi_reduction <add>, %130, %cst_63 [0] : vector<4x128xf32> to vector<128xf32>
    %132 = vector.shape_cast %131 : vector<128xf32> to vector<1x128xf32>
    %133 = tpu.concatenate %129, %132 in 0 : vector<1x128xf32>, vector<1x128xf32> -> vector<2x128xf32>
    %cst_64 = arith.constant dense<0.000000e+00> : vector<2x64xf32>
    %134 = tpu.matmul %133, %125, %cst_64 {dimension_numbers = #tpu.dot_dimension_numbers<[1], [0], [0], [1], [0, 0, 1, 1], [], []>} : vector<2x128xf32>, vector<128x64xf32>, vector<2x64xf32> -> vector<2x64xf32>
    %135 = vector.extract_strided_slice %134 {offsets = [0, 0], sizes = [1, 64], strides = [1, 1]} : vector<2x64xf32> to vector<1x64xf32>
    %cst_65 = arith.constant 1.250000e-01 : f32
    %136 = vector.broadcast %cst_65 : f32 to vector<1x64xf32>
    %137 = arith.mulf %135, %136 : vector<1x64xf32>
    %138 = vector.extract_strided_slice %134 {offsets = [1, 0], sizes = [1, 64], strides = [1, 1]} : vector<2x64xf32> to vector<1x64xf32>
    %cst_66 = arith.constant 1.250000e-01 : f32
    %139 = vector.broadcast %cst_66 : f32 to vector<1x64xf32>
    %140 = arith.mulf %138, %139 : vector<1x64xf32>
    %141 = arith.mulf %137, %137 : vector<1x64xf32>
    %142 = arith.subf %140, %141 : vector<1x64xf32>
    %cst_67 = arith.constant 0.000000e+00 : f32
    %143 = vector.broadcast %cst_67 : f32 to vector<1x64xf32>
    %144 = arith.maximumf %142, %143 : vector<1x64xf32>
    %145 = vector.extract_strided_slice %127 {offsets = [0, 0], sizes = [1, 64], strides = [1, 1]} : vector<2x64xf32> to vector<1x64xf32>
    %cst_68 = arith.constant 9.99999974E-6 : f32
    %146 = vector.broadcast %cst_68 : f32 to vector<1x64xf32>
    %147 = arith.addf %144, %146 : vector<1x64xf32>
    %148 = math.rsqrt %147 : vector<1x64xf32>
    %149 = arith.mulf %145, %148 : vector<1x64xf32>
    %150 = vector.extract_strided_slice %127 {offsets = [1, 0], sizes = [1, 64], strides = [1, 1]} : vector<2x64xf32> to vector<1x64xf32>
    %151 = arith.mulf %137, %149 : vector<1x64xf32>
    %152 = arith.subf %150, %151 : vector<1x64xf32>
    %153 = tpu.concatenate %149, %152 in 0 : vector<1x64xf32>, vector<1x64xf32> -> vector<2x64xf32>
    %cst_69 = arith.constant dense<0.000000e+00> : vector<2x128xf32>
    %154 = tpu.matmul %153, %126, %cst_69 {dimension_numbers = #tpu.dot_dimension_numbers<[1], [0], [0], [1], [0, 0, 1, 1], [], []>} : vector<2x64xf32>, vector<64x128xf32>, vector<2x128xf32> -> vector<2x128xf32>
    %155 = vector.extract_strided_slice %154 {offsets = [0, 0], sizes = [1, 128], strides = [1, 1]} : vector<2x128xf32> to vector<1x128xf32>
    %156 = vector.broadcast %155 : vector<1x128xf32> to vector<4x128xf32>
    %157 = arith.mulf %124, %156 : vector<4x128xf32>
    %158 = vector.extract_strided_slice %154 {offsets = [1, 0], sizes = [1, 128], strides = [1, 1]} : vector<2x128xf32> to vector<1x128xf32>
    %159 = vector.broadcast %158 : vector<1x128xf32> to vector<4x128xf32>
    %160 = arith.addf %157, %159 : vector<4x128xf32>
    %cst_70 = arith.constant 0.000000e+00 : f32
    %161 = vector.broadcast %cst_70 : f32 to vector<4x128xf32>
    %162 = arith.maximumf %160, %161 : vector<4x128xf32>
    %163 = arith.truncf %162 : vector<4x128xf32> to vector<4x128xbf16>
    %c1088 = arith.constant 1088 : index
    %c0_71 = arith.constant 0 : index
    %164 = vector.load %arg1[%c1088, %c0_71] : memref<1728x128xbf16, #tpu.memory_space<vmem>>, vector<2x4xbf16>
    %cst_72 = arith.constant dense<0.000000e+00> : vector<2x128xf32>
    %165 = tpu.matmul %164, %163, %cst_72 {dimension_numbers = #tpu.dot_dimension_numbers<[1], [0], [0], [1], [0, 0, 1, 1], [], []>} : vector<2x4xbf16>, vector<4x128xbf16>, vector<2x128xf32> -> vector<2x128xf32>
    %166 = arith.truncf %165 : vector<2x128xf32> to vector<2x128xbf16>
    %c1104 = arith.constant 1104 : index
    %c0_73 = arith.constant 0 : index
    %167 = vector.load %arg1[%c1104, %c0_73] : memref<1728x128xbf16, #tpu.memory_space<vmem>>, vector<2x4xbf16>
    %cst_74 = arith.constant dense<0.000000e+00> : vector<2x128xf32>
    %168 = tpu.matmul %167, %163, %cst_74 {dimension_numbers = #tpu.dot_dimension_numbers<[1], [0], [0], [1], [0, 0, 1, 1], [], []>} : vector<2x4xbf16>, vector<4x128xbf16>, vector<2x128xf32> -> vector<2x128xf32>
    %169 = arith.truncf %168 : vector<2x128xf32> to vector<2x128xbf16>
    %c1120 = arith.constant 1120 : index
    %c0_75 = arith.constant 0 : index
    %170 = vector.load %arg1[%c1120, %c0_75] : memref<1728x128xbf16, #tpu.memory_space<vmem>>, vector<2x4xbf16>
    %cst_76 = arith.constant dense<0.000000e+00> : vector<2x128xf32>
    %171 = tpu.matmul %170, %163, %cst_76 {dimension_numbers = #tpu.dot_dimension_numbers<[1], [0], [0], [1], [0, 0, 1, 1], [], []>} : vector<2x4xbf16>, vector<4x128xbf16>, vector<2x128xf32> -> vector<2x128xf32>
    %172 = arith.truncf %171 : vector<2x128xf32> to vector<2x128xbf16>
    %c1136 = arith.constant 1136 : index
    %c0_77 = arith.constant 0 : index
    %173 = vector.load %arg1[%c1136, %c0_77] : memref<1728x128xbf16, #tpu.memory_space<vmem>>, vector<2x4xbf16>
    %cst_78 = arith.constant dense<0.000000e+00> : vector<2x128xf32>
    %174 = tpu.matmul %173, %163, %cst_78 {dimension_numbers = #tpu.dot_dimension_numbers<[1], [0], [0], [1], [0, 0, 1, 1], [], []>} : vector<2x4xbf16>, vector<4x128xbf16>, vector<2x128xf32> -> vector<2x128xf32>
    %175 = arith.truncf %174 : vector<2x128xf32> to vector<2x128xbf16>
    %176 = tpu.concatenate %166, %169, %172, %175 in 1 : vector<2x128xbf16>, vector<2x128xbf16>, vector<2x128xbf16>, vector<2x128xbf16> -> vector<2x512xbf16>
    %c1152 = arith.constant 1152 : index
    %c0_79 = arith.constant 0 : index
    %177 = vector.load %arg1[%c1152, %c0_79] : memref<1728x128xbf16, #tpu.memory_space<vmem>>, vector<512x64xbf16>
    %cst_80 = arith.constant dense<0.000000e+00> : vector<2x64xf32>
    %178 = tpu.matmul %176, %177, %cst_80 {dimension_numbers = #tpu.dot_dimension_numbers<[1], [0], [0], [1], [0, 0, 1, 1], [], []>} : vector<2x512xbf16>, vector<512x64xbf16>, vector<2x64xf32> -> vector<2x64xf32>
    %c448 = arith.constant 448 : index
    %c0_81 = arith.constant 0 : index
    %179 = vector.load %arg2[%c448, %c0_81] : memref<592x128xf32, #tpu.memory_space<vmem>>, vector<64x64xf32>
    %c512_82 = arith.constant 512 : index
    %c0_83 = arith.constant 0 : index
    %180 = vector.load %arg2[%c512_82, %c0_83] : memref<592x128xf32, #tpu.memory_space<vmem>>, vector<64x64xf32>
    %c576_84 = arith.constant 576 : index
    %c0_85 = arith.constant 0 : index
    %181 = vector.load %arg2[%c576_84, %c0_85] : memref<592x128xf32, #tpu.memory_space<vmem>>, vector<2x64xf32>
    %cst_86 = arith.constant dense<0.000000e+00> : vector<64xf32>
    %182 = vector.multi_reduction <add>, %178, %cst_86 [0] : vector<2x64xf32> to vector<64xf32>
    %183 = vector.shape_cast %182 : vector<64xf32> to vector<1x64xf32>
    %184 = arith.mulf %178, %178 : vector<2x64xf32>
    %cst_87 = arith.constant dense<0.000000e+00> : vector<64xf32>
    %185 = vector.multi_reduction <add>, %184, %cst_87 [0] : vector<2x64xf32> to vector<64xf32>
    %186 = vector.shape_cast %185 : vector<64xf32> to vector<1x64xf32>
    %187 = tpu.concatenate %183, %186 in 0 : vector<1x64xf32>, vector<1x64xf32> -> vector<2x64xf32>
    %cst_88 = arith.constant dense<0.000000e+00> : vector<2x64xf32>
    %188 = tpu.matmul %187, %179, %cst_88 {dimension_numbers = #tpu.dot_dimension_numbers<[1], [0], [0], [1], [0, 0, 1, 1], [], []>} : vector<2x64xf32>, vector<64x64xf32>, vector<2x64xf32> -> vector<2x64xf32>
    %189 = vector.extract_strided_slice %188 {offsets = [0, 0], sizes = [1, 64], strides = [1, 1]} : vector<2x64xf32> to vector<1x64xf32>
    %cst_89 = arith.constant 5.000000e-01 : f32
    %190 = vector.broadcast %cst_89 : f32 to vector<1x64xf32>
    %191 = arith.mulf %189, %190 : vector<1x64xf32>
    %192 = vector.extract_strided_slice %188 {offsets = [1, 0], sizes = [1, 64], strides = [1, 1]} : vector<2x64xf32> to vector<1x64xf32>
    %cst_90 = arith.constant 5.000000e-01 : f32
    %193 = vector.broadcast %cst_90 : f32 to vector<1x64xf32>
    %194 = arith.mulf %192, %193 : vector<1x64xf32>
    %195 = arith.mulf %191, %191 : vector<1x64xf32>
    %196 = arith.subf %194, %195 : vector<1x64xf32>
    %cst_91 = arith.constant 0.000000e+00 : f32
    %197 = vector.broadcast %cst_91 : f32 to vector<1x64xf32>
    %198 = arith.maximumf %196, %197 : vector<1x64xf32>
    %199 = vector.extract_strided_slice %181 {offsets = [0, 0], sizes = [1, 64], strides = [1, 1]} : vector<2x64xf32> to vector<1x64xf32>
    %cst_92 = arith.constant 9.99999974E-6 : f32
    %200 = vector.broadcast %cst_92 : f32 to vector<1x64xf32>
    %201 = arith.addf %198, %200 : vector<1x64xf32>
    %202 = math.rsqrt %201 : vector<1x64xf32>
    %203 = arith.mulf %199, %202 : vector<1x64xf32>
    %204 = vector.extract_strided_slice %181 {offsets = [1, 0], sizes = [1, 64], strides = [1, 1]} : vector<2x64xf32> to vector<1x64xf32>
    %205 = arith.mulf %191, %203 : vector<1x64xf32>
    %206 = arith.subf %204, %205 : vector<1x64xf32>
    %207 = tpu.concatenate %203, %206 in 0 : vector<1x64xf32>, vector<1x64xf32> -> vector<2x64xf32>
    %cst_93 = arith.constant dense<0.000000e+00> : vector<2x64xf32>
    %208 = tpu.matmul %207, %180, %cst_93 {dimension_numbers = #tpu.dot_dimension_numbers<[1], [0], [0], [1], [0, 0, 1, 1], [], []>} : vector<2x64xf32>, vector<64x64xf32>, vector<2x64xf32> -> vector<2x64xf32>
    %209 = vector.extract_strided_slice %208 {offsets = [0, 0], sizes = [1, 64], strides = [1, 1]} : vector<2x64xf32> to vector<1x64xf32>
    %210 = vector.broadcast %209 : vector<1x64xf32> to vector<2x64xf32>
    %211 = arith.mulf %178, %210 : vector<2x64xf32>
    %212 = vector.extract_strided_slice %208 {offsets = [1, 0], sizes = [1, 64], strides = [1, 1]} : vector<2x64xf32> to vector<1x64xf32>
    %213 = vector.broadcast %212 : vector<1x64xf32> to vector<2x64xf32>
    %214 = arith.addf %211, %213 : vector<2x64xf32>
    %cst_94 = arith.constant 0.000000e+00 : f32
    %215 = vector.broadcast %cst_94 : f32 to vector<2x64xf32>
    %216 = arith.maximumf %214, %215 : vector<2x64xf32>
    %217 = arith.truncf %216 : vector<2x64xf32> to vector<2x64xbf16>
    %c1664 = arith.constant 1664 : index
    %c0_95 = arith.constant 0 : index
    %218 = vector.load %arg1[%c1664, %c0_95] : memref<1728x128xbf16, #tpu.memory_space<vmem>>, vector<64x10xbf16>
    %cst_96 = arith.constant dense<0.000000e+00> : vector<2x10xf32>
    %219 = tpu.matmul %217, %218, %cst_96 {dimension_numbers = #tpu.dot_dimension_numbers<[1], [0], [0], [1], [0, 0, 1, 1], [], []>} : vector<2x64xbf16>, vector<64x10xbf16>, vector<2x10xf32> -> vector<2x10xf32>
    %c584 = arith.constant 584 : index
    %c0_97 = arith.constant 0 : index
    %220 = vector.load %arg2[%c584, %c0_97] : memref<592x128xf32, #tpu.memory_space<vmem>>, vector<1x10xf32>
    %221 = vector.broadcast %220 : vector<1x10xf32> to vector<2x10xf32>
    %222 = arith.addf %219, %221 : vector<2x10xf32>
    %c0_98 = arith.constant 0 : index
    %c0_99 = arith.constant 0 : index
    %223 = vector.load %arg3[%c0_98, %c0_99] : memref<2x10xf32, #tpu.memory_space<vmem>>, vector<2x10xf32>
    tpu.vector_store %arg3[%c0_98, %c0_99], %222 {strides = array<i32>} : memref<2x10xf32, #tpu.memory_space<vmem>>, vector<2x10xf32>,
    return
  }
}

</mosaic_0001>

<bundles_post_ra>
// kernel: _lambda_.1
= control target key start
LH: loop header
LB: loop body
LE: loop exit
PB: predicated region body
PF: predicated region fallthrough
CT: control target
= control target key end

     0   :  { %8 = vsyncpa [#allocation3], 0  ;;  %s3938_s0 = inlined_call_operand.vmem [shape: f32[32,32], index: 0, kind: input, shape index: {}]   ;;  %s3939_s1 = inlined_call_operand.hbm [shape: bf16[1728,128], index: 1, kind: input, shape index: {}]   ;;  %s3940_s2 = inlined_call_operand.hbm [shape: f32[592,128], index: 2, kind: input, shape index: {}]   ;;  %s3941_s3 = inlined_call_operand.hbm [shape: f32[2,10], index: 3, kind: output, shape index: {}]  }
   0x1   :  { %9 = vsyncpa [#allocation6], 0 }
   0x2   :  { %10 = vsyncpa [#allocation4], 0  ;;  %s3678_s12 = smov [#allocation2]   ;;  %s3606_s16 = scalar_lea.hbm %s3939_s1, 13824 }
   0x3   :  { %s18_s13 = sshll.u32 %s3678_s12, 4  ;;  %p3607_p0 = scmp.ne.s32.totalorder %s3939_s1, %s3606_s16  ;;  %s19_s13 = int_to_ptr.vmem [resolvable:$true] %s18_s13 }
   0x4   :  { %p3610_p1 = scmp.lt.u32.totalorder %s3606_s16, %s3939_s1 }
   0x6   :  { %p3612_p2 = pnand %p3610_p1, %p3607_p0 }
   0x8   :  { %3615 = shalt.err (!%p3612_p2)
}
   0x9   :  { %s3616_s21 = scalar_lea.vmem %s19_s13, 13824  ;;  %p3621_p4 = scmp.lt.s32.totalorder %s19_s13, %s19_s13 }
   0xa   :  { %p3617_p3 = scmp.ne.s32.totalorder %s19_s13, %s3616_s21  ;;  %p3622_p5 = scmp.lt.s32.totalorder %s3616_s21, %s3616_s21 }
   0xc   :  { %p3623_p6 = por %p3622_p5, %p3621_p4 }
   0xe   :  { %p3624_p7 = pnand %p3623_p6, %p3617_p3 }
  0x10   :  { %3627 = shalt.err (!%p3624_p7)
}
  0x11   :  { %s3679_s22 = smov 64   ;;  %s3680_s23 = smov 4  }
  0x12   :  { %24 = dma.hbm_to_vmem [thread:$0]  %s3939_s1, 13824, %s19_s13, [#allocation3], %s3679_s22, %s3679_s22, %s3680_s23  }
  0x13   :  { %s3681_s26 = smov [#allocation5]   ;;  %s3628_s30 = scalar_lea.hbm %s3940_s2, 9472 }
  0x14   :  { %s30_s27 = sshll.u32 %s3681_s26, 4  ;;  %p3629_p8 = scmp.ne.s32.totalorder %s3940_s2, %s3628_s30  ;;  %s31_s27 = int_to_ptr.vmem [resolvable:$true] %s30_s27 }
  0x15   :  { %p3632_p9 = scmp.lt.u32.totalorder %s3628_s30, %s3940_s2 }
  0x17   :  { %p3634_p10 = pnand %p3632_p9, %p3629_p8 }
  0x19   :  { %3637 = shalt.err (!%p3634_p10)
}
  0x1a   :  { %s3638_s8 = scalar_lea.vmem %s31_s27, 9472  ;;  %p3643_p12 = scmp.lt.s32.totalorder %s31_s27, %s31_s27 }
  0x1b   :  { %p3639_p11 = scmp.ne.s32.totalorder %s31_s27, %s3638_s8  ;;  %p3644_p13 = scmp.lt.s32.totalorder %s3638_s8, %s3638_s8 }
  0x1d   :  { %p3645_p0 = por %p3644_p13, %p3643_p12 }
  0x1f   :  { %p3646_p1 = pnand %p3645_p0, %p3639_p11 }
  0x21   :  { %3649 = shalt.err (!%p3646_p1)
}
  0x22   :  { %s3682_s1 = smov 128   ;;  %s3683_s9 = smov 8  }
  0x23   :  { %36 = dma.hbm_to_vmem [thread:$0]  %s3940_s2, 9472, %s31_s27, [#allocation6], %s3682_s1, %s3682_s1, %s3683_s9  }
  0x24   :  { %3672 = dma.done.wait [#allocation3], 13824  }
  0x25   :  { %3673 = vsyncadd [#allocation3], 4294953472 }
  0x26   :  { %3674 = dma.done.wait [#allocation6], 9472  }
  0x27   :  { %3675 = vsyncadd [#allocation6], 4294957824  ;;  %v3684_v0 = vmov 0.0   ;;  %vm3685_vm0 = vmmov 0   ;;  %v44_v1 = vld [vmem:[%s3938_s0] sm:$0xff]  ;;  %v45_v2 = vld [vmem:[%s3938_s0 + $0x8] sm:$0xff] }
  0x28   :  { %3090 = vmatprep.subr.bf16.mxu0 %v3684_v0  ;;  %3094 = vmatprep.mubr.msk.bf16.mxu0 %vm3685_vm0, %v3684_v0  ;;  %v46_v3 = vld [vmem:[%s3938_s0 + $0x10] sm:$0xff]  ;;  %v48_v4 = vpack.c.bf16 %v45_v2, %v44_v1  ;;  %v47_v5 = vld [vmem:[%s3938_s0 + $0x18] sm:$0xff]  ;;  %v3502_v7 = vld [vmem:[#allocation2] sm:$0xff]   ;;  %vm57_vm1 = vcmask 261120   ;;  %s3686_s0 = smov 96   ;;  %s3687_s19 = smov 32  }
  0x29   :  { %3114 = vmatprep.subr.bf16.mxu1 %v3684_v0  ;;  %3118 = vmatprep.mubr.msk.bf16.mxu1 %vm3685_vm0, %v3684_v0  ;;  %v49_v6 = vpack.c.bf16 %v47_v5, %v46_v3  ;;  %v3504_v8 = vld [vmem:[#allocation2 + $0x18] sm:$0xff]   ;;  %v3503_v9 = vld [vmem:[#allocation2 + $0x8] sm:$0xff]   ;;  %v3505_v10 = vld [vmem:[#allocation2 + $0x10] sm:$0xff]   ;;  %vm271_vm2 = vcmask 523264   ;;  %vm274_vm3 = vcmask 785408   ;;  %v3688_v48 = vmov 0.0|0.0  }
  0x2a   :  { %3091 = vmatpush3.bf16.msra.mxu0 %v48_v4  ;;  %3115 = vmatpush3.bf16.msra.mxu1 %v48_v4  ;;  %v3506_v11 = vld [vmem:[#allocation2 + $0x20] sm:$0xff]   ;;  %v3507_v12 = vld [vmem:[#allocation2 + $0x28] sm:$0xff]   ;;  %v3508_v13 = vld [vmem:[#allocation2 + $0x30] sm:$0xff]   ;;  %vm413_vm4 = vcmask 1040384   ;;  %vm507_vm5 = vcmask 64512   ;;  %vm597_vm6 = vcmask 130048  }
  0x2b   :  { %3092 = vmatprep.subr.bf16.mxu0 %v3684_v0  ;;  %3116 = vmatprep.subr.bf16.mxu1 %v3684_v0  ;;  %v3509_v14 = vld [vmem:[#allocation2 + $0x38] sm:$0xff]   ;;  %v3510_v15 = vld [vmem:[#allocation2 + $0x40] sm:$0xff]   ;;  %v3511_v16 = vld [vmem:[#allocation2 + $0x48] sm:$0xff]   ;;  %vm1172_vm7 = vcmask 1043456   ;;  %vm1908_vm8 = vcmask 1041408   ;;  %vm1904_vm9 = vcmask 31744  }
  0x2c   :  { %v3512_v19 = vld [vmem:[#allocation2 + $0x50] sm:$0xff]   ;;  %v3513_v24 = vld [vmem:[#allocation2 + $0x58] sm:$0xff]   ;;  %v383_v45 = vld [vmem:[#allocation5] sm:$0xff]  ;;  %vm2441_vm10 = vcmask 517120   ;;  %s3689_s20 = smov [#allocation7]   ;;  %vm2715_vm11 = vcmask 74752  }
  0x2d   :  { %v384_v46 = vld [vmem:[#allocation5 + $0x8] sm:$0xff]  ;;  %v385_v49 = vld [vmem:[#allocation5 + $0x10] sm:$0xff]  ;;  %v386_v50 = vld [vmem:[#allocation5 + $0x18] sm:$0xff]  ;;  %s2723_s21 = sshll.u32 %s3689_s20, 4  ;;  %s2724_s21 = int_to_ptr.vmem [resolvable:$true] %s2723_s21 }
  0x2e   :  { %3093 = vmatpush3.bf16.msra.mxu0 %v49_v6  ;;  %3117 = vmatpush3.bf16.msra.mxu1 %v49_v6  ;;  %v3389_v47 = vpack.c.bf16 %v384_v46, %v383_v45  ;;  %v3392_v51 = vpack.c.bf16 %v386_v50, %v385_v49  ;;  %v387_v52 = vld [vmem:[#allocation5 + $0x20] sm:$0xff]  ;;  %v388_v53 = vld [vmem:[#allocation5 + $0x28] sm:$0xff]  ;;  %v389_v55 = vld [vmem:[#allocation5 + $0x30] sm:$0xff]  ;;  %p3655_p3 = scmp.lt.s32.totalorder %s2724_s21, %s2724_s21 }
  0x2f   :  { %3098 = vmatprep.subr.bf16.mxu0 %v3684_v0  ;;  %3388 = vmatprep.subr.bf16.mxu1 %v3688_v48  ;;  %v3395_v54 = vpack.c.bf16 %v388_v53, %v387_v52  ;;  %v390_v56 = vld [vmem:[#allocation5 + $0x38] sm:$0xff]  ;;  %v596_v53 = vld [vmem:[#allocation2 + $0x60] sm:$0xf] }
  0x30   :  { %v3398_v57 = vpack.c.bf16 %v390_v56, %v389_v55  ;;  %v642_v55 = vld [vmem:[#allocation2 + $0x68] sm:$0xf]  ;;  %v732_v56 = vld [vmem:[#allocation2 + $0x78] sm:$0xf] }
  0x31   :  { %3095 = vmatmul.mubr.msk.bf16.vlgmr.msra.gmra.mrb[0].mxu0 %vm57_vm1, %v3502_v7  ;;  %3119 = vmatmul.mubr.msk.bf16.vlgmr.msra.gmra.mrb[0].mxu1 %vm57_vm1, %v3504_v8 }
  0x32   :  { %3099 = vmatpush3.bf16.msra.mxu0 %v48_v4  ;;  %3102 = vmatprep.mubr.msk.bf16.mxu0 %vm3685_vm0, %v3684_v0 }
  0x33   :  { %3100 = vmatprep.subr.bf16.mxu0 %v3684_v0  ;;  %3158 = vmatprep.mubr.msk.f32.mxu1 %vm3685_vm0, %v3684_v0 }
  0x34   :  { %3390 = vmatpush3.bf16.msra.mxu1 %v3389_v47 }
  0x35   :  { %3391 = vmatprep.subr.bf16.mxu1 %v3688_v48 }
  0x36   :  { %3101 = vmatpush3.bf16.msra.mxu0 %v49_v6 }
  0x37   :  { %3106 = vmatprep.subr.bf16.mxu0 %v3684_v0 }
  0x38   :  { %3393 = vmatpush3.bf16.msra.mxu1 %v3392_v51 }
  0x39   :  { %3103 = vmatmul.mubr.msk.bf16.vlgmr.msra.gmra.mrb[4].mxu0 %vm57_vm1, %v3503_v9  ;;  %3394 = vmatprep.subr.bf16.mxu1 %v3688_v48 }
  0x3a   :  { %3107 = vmatpush3.bf16.msra.mxu0 %v48_v4  ;;  %3110 = vmatprep.mubr.msk.bf16.mxu0 %vm3685_vm0, %v3684_v0 }
  0x3b   :  { %3108 = vmatprep.subr.bf16.mxu0 %v3684_v0 }
  0x3c   :  { %3396 = vmatpush3.bf16.msra.mxu1 %v3395_v54  ;;  %v687_v54 = vld [vmem:[#allocation2 + $0x70] sm:$0xf] }
  0x3d   :  { %3397 = vmatprep.subr.bf16.mxu1 %v3688_v48 }
  0x3e   :  { %3109 = vmatpush3.bf16.msra.mxu0 %v49_v6 }
  0x3f   :  { %3122 = vmatprep.subr.bf16.mxu0 %v3684_v0 }
  0x40   :  { %3399 = vmatpush3.bf16.msra.mxu1 %v3398_v57  ;;  %v3514_v57 = vld [vmem:[#allocation2 + $0xc0] sm:$0xff]  }
  0x41   :  { %3111 = vmatmul.mubr.msk.bf16.vlgmr.msra.gmra.mrb[8].mxu0 %vm57_vm1, %v3505_v10  ;;  %3161 = vmatprep.subr.mxu1 %v3684_v0 }
  0x42   :  { %3138 = vmatprep.mubr.msk.bf16.mxu0 %vm3685_vm0, %v3684_v0  ;;  %3123 = vmatpush3.bf16.msra.mxu0 %v3506_v11 }
  0x43   :  { %3124 = vmatprep.subr.bf16.mxu0 %v3684_v0 }
  0x46   :  { %3125 = vmatpush3.bf16.msra.mxu0 %v3507_v12 }
  0x47   :  { %3126 = vmatprep.subr.bf16.mxu0 %v3684_v0 }
  0x4a   :  { %3127 = vmatpush3.bf16.msra.mxu0 %v3508_v13 }
  0x4b   :  { %3128 = vmatprep.subr.bf16.mxu0 %v3684_v0 }
  0x4e   :  { %3129 = vmatpush3.bf16.msra.mxu0 %v3509_v14 }
  0x4f   :  { %3130 = vmatprep.subr.bf16.mxu0 %v3684_v0 }
  0x52   :  { %3131 = vmatpush3.bf16.msra.mxu0 %v3510_v15 }
  0x53   :  { %3132 = vmatprep.subr.bf16.mxu0 %v3684_v0 }
  0x56   :  { %3133 = vmatpush3.bf16.msra.mxu0 %v3511_v16 }
  0x57   :  { %3134 = vmatprep.subr.bf16.mxu0 %v3684_v0 }
  0x5a   :  { %3135 = vmatpush3.bf16.msra.mxu0 %v3512_v19 }
  0x5b   :  { %3136 = vmatprep.subr.bf16.mxu0 %v3684_v0 }
  0x5e   :  { %3137 = vmatpush3.bf16.msra.mxu0 %v3513_v24 }
  0x5f   :  { %3178 = vmatprep.subr.bf16.mxu0 %v3684_v0 }
 0x104   :  { %v95_v17 = vpop.f32.mrb[0].mxu0  ;;  %v251_v18 = vpop.f32.mrb[0].mxu1 }
 0x105   :  { %v3096_v20 = vpop.f32.mrb[1].mxu0  ;;  %v3120_v21 = vpop.f32.mrb[1].mxu1 }
 0x106   :  { %v98_v22 = vpop.f32.mrb[2].mxu0  ;;  %v254_v23 = vpop.f32.mrb[2].mxu1  ;;  %v391_v20 = vld [vmem:[#allocation5 + $0x40] sm:$0xff] }
 0x107   :  { %v102_v25 = vpack.c.bf16 %v98_v22, %v95_v17  ;;  %v3097_v26 = vpop.f32.mrb[3].mxu0  ;;  %v258_v27 = vpack.c.bf16 %v254_v23, %v251_v18  ;;  %v3121_v28 = vpop.f32.mrb[3].mxu1 }
 0x109   :  { %266 = vrot.lane.b32.xlu1 %v258_v27, %s3686_s0 }
 0x10c   :  { %v147_v29 = vpop.f32.mrb[4].mxu0 }
 0x10d   :  { %v3104_v30 = vpop.f32.mrb[5].mxu0 }
 0x10e   :  { %v150_v31 = vpop.f32.mrb[6].mxu0  ;;  %v392_v30 = vld [vmem:[#allocation5 + $0x48] sm:$0x3] }
 0x10f   :  { %v154_v32 = vpack.c.bf16 %v150_v31, %v147_v29  ;;  %v3105_v33 = vpop.f32.mrb[7].mxu0 }
 0x111   :  { %260 = vrot.lane.b32.xlu0 %v154_v32, %s3687_s19 }
 0x114   :  { %v199_v34 = vpop.f32.mrb[8].mxu0 }
 0x115   :  { %v3112_v35 = vpop.f32.mrb[9].mxu0 }
 0x116   :  { %v202_v36 = vpop.f32.mrb[10].mxu0 }
 0x117   :  { %v206_v37 = vpack.c.bf16 %v202_v36, %v199_v34  ;;  %v3113_v38 = vpop.f32.mrb[11].mxu0 }
 0x119   :  { %263 = vrot.lane.b32.xlu0 %v206_v37, %s3679_s22  ;;  %v581_v37 = vlaneseq }
 0x11b   :  { %v582_v38 = vshrl.u32 %v581_v37, 7 }
 0x17b   :  { %v267_v42 = vpop.permute.xlu1 %266 }
 0x183   :  { %v261_v39 = vpop.permute.xlu0 %260 }
 0x184   :  { %v270_v40 = vsel %vm57_vm1, %v102_v25, %v261_v39  ;;  %v3804_v39 = vsub.s32 0, %v582_v38 }
 0x18b   :  { %v264_v41 = vpop.permute.xlu0 %263 }
 0x18c   :  { %v273_v43 = vsel %vm271_vm2, %v270_v40, %v264_v41  ;;  %v3806_v40 = vsub.s32 1, %v582_v38 }
 0x18d   :  { %v276_v44 = vsel %vm274_vm3, %v273_v43, %v267_v42 }
 0x18e   :  { %3139 = vmatmul.mubr.bf16.vlgmr.msra.gmra.mrb[12].mxu0 %v276_v44 }
 0x18f   :  { %3180 = vmatprep.mubr.msk.bf16.mxu0 %vm3685_vm0, %v3684_v0 }
 0x261   :  { %v376_v58 = vpop.f32.mrb[12].mxu0 }
 0x262   :  { %v402_v59 = vmul.f32 %v376_v58, %v376_v58  ;;  %v3140_v60 = vpop.f32.mrb[13].mxu0  ;;  %v393_v62 = vsel %vm271_vm2, %v376_v58, 0.0 }
 0x263   :  { %v379_v61 = vpop.f32.mrb[14].mxu0  ;;  %v3517_v60 = vld [vmem:[#allocation2 + $0x88] sm:$0xff]  }
 0x264   :  { %v394_v63 = vsel %vm271_vm2, %v379_v61, 0.0  ;;  %v403_v1 = vmul.f32 %v379_v61, %v379_v61  ;;  %v3141_v2 = vpop.f32.mrb[15].mxu0  ;;  %v404_v4 = vsel %vm271_vm2, %v402_v59, 0.0  ;;  %v3516_v59 = vld [vmem:[#allocation2 + $0xc8] sm:$0xff]  }
 0x265   :  { %v395_v3 = vadd.f32 %v394_v63, %v393_v62  ;;  %v3519_v62 = vld [vmem:[#allocation2 + $0x90] sm:$0xff]   ;;  %v3520_v63 = vld [vmem:[#allocation2 + $0xd8] sm:$0xff]   ;;  %v3522_v2 = vld [vmem:[#allocation2 + $0xe0] sm:$0xff]  }
 0x266   :  { %v405_v5 = vsel %vm271_vm2, %v403_v1, 0.0  ;;  %v3521_v1 = vld [vmem:[#allocation2 + $0x98] sm:$0xff]  }
 0x267   :  { %v396_v6 = vrot.slane %v395_v3, 4  ;;  %v406_v7 = vadd.f32 %v405_v5, %v404_v4  ;;  %v3524_v4 = vld [vmem:[#allocation2 + $0xe8] sm:$0xff]  }
 0x268   :  { %v3525_v5 = vld [vmem:[#allocation2 + $0xa8] sm:$0xff]  }
 0x269   :  { %v397_v8 = vadd.f32 %v396_v6, %v395_v3  ;;  %v407_v9 = vrot.slane %v406_v7, 4  ;;  %v3523_v3 = vld [vmem:[#allocation2 + $0xa0] sm:$0xff]   ;;  %v3526_v6 = vld [vmem:[#allocation2 + $0xf0] sm:$0xff]  }
 0x26b   :  { %v398_v10 = vrot.slane %v397_v8, 2  ;;  %v408_v11 = vadd.f32 %v407_v9, %v406_v7  ;;  %v3527_v7 = vld [vmem:[#allocation2 + $0xb0] sm:$0xff]  }
 0x26d   :  { %v399_v12 = vadd.f32 %v398_v10, %v397_v8  ;;  %v409_v13 = vrot.slane %v408_v11, 2  ;;  %v3528_v8 = vld [vmem:[#allocation2 + $0xf8] sm:$0xff]  }
 0x26f   :  { %v400_v14 = vrot.slane %v399_v12, 1  ;;  %v410_v15 = vadd.f32 %v409_v13, %v408_v11  ;;  %v3529_v13 = vld [vmem:[#allocation2 + $0xb8] sm:$0xff]  }
 0x271   :  { %v411_v16 = vrot.slane %v410_v15, 1  ;;  %v401_v17 = vadd.f32 %v400_v14, %v399_v12 }
 0x273   :  { %v412_v18 = vadd.f32 %v411_v16, %v410_v15 }
 0x275   :  { %v414_v19 = vsel %vm413_vm4, %v401_v17, %v412_v18 }
 0x276   :  { %3159 = vmatmul.mubr.msk.f32.vlgmr.msra.gmra.mrb[4].mxu1 %vm271_vm2, %v414_v19  ;;  %v959_v19 = vld [vmem:[#allocation5 + $0x50] sm:$0xff] }
 0x277   :  { %3163 = vmatprep.mubr.msk.f32.mxu1 %vm3685_vm0, %v3684_v0  ;;  %3162 = vmatpush3.msra.mxu1 %v391_v20  ;;  %v960_v20 = vld [vmem:[#allocation5 + $0x58] sm:$0xff] }
 0x278   :  { %3166 = vmatprep.subr.bf16.mxu1 %v3684_v0 }
 0x349   :  { %v484_v21 = vpop.f32.mrb[4].mxu1 }
 0x34a   :  { %v488_v22 = vmul.f32 0.0078125, %v484_v21  ;;  %v3160_v23 = vpop.f32.mrb[5].mxu1  ;;  %v961_v21 = vld [vmem:[#allocation5 + $0x60] sm:$0xff] }
 0x34c   :  { %v489_v24 = vmul.f32 %v488_v22, %v488_v22 }
 0x34e   :  { %v491_v25 = vrot.slane %v489_v24, 7  ;;  %v3401_v24 = vpack.c.bf16 %v960_v20, %v959_v19  ;;  %v977_v20 = vld [vmem:[#allocation5 + $0xe0] sm:$0xff] }
 0x350   :  { %v493_v26 = vsub.f32 %v488_v22, %v491_v25  ;;  %v962_v25 = vld [vmem:[#allocation5 + $0x68] sm:$0xff] }
 0x352   :  { %v494_v27 = vmax.f32 %v493_v26, 0.0 }
 0x354   :  { %v495_v28 = vadd.f32 1e-05, %v494_v27 }
 0x356   :  { %3598 = vrsqrt.f32 %v495_v28  ;;  %v3404_v28 = vpack.c.bf16 %v962_v25, %v961_v21  ;;  %v978_v21 = vld [vmem:[#allocation5 + $0xe8] sm:$0xff] }
 0x360   :  { %v3599_v29 = vpop.eup %3598 }
 0x361   :  { %v498_v31 = vrot.slane %v3599_v29, 1  ;;  %v963_v29 = vld [vmem:[#allocation5 + $0x70] sm:$0xff] }
 0x363   :  { %v500_v32 = vmul.f32 %v498_v31, %v392_v30 }
 0x365   :  { %v501_v33 = vmul.f32 %v500_v32, %v488_v22 }
 0x367   :  { %v503_v34 = vrot.slane %v501_v33, 7 }
 0x369   :  { %v505_v35 = vsub.f32 %v392_v30, %v503_v34  ;;  %v964_v30 = vld [vmem:[#allocation5 + $0x78] sm:$0xff] }
 0x36a   :  { %v3407_v31 = vpack.c.bf16 %v964_v30, %v963_v29 }
 0x36b   :  { %v506_v36 = vsel %vm413_vm4, %v500_v32, %v505_v35 }
 0x36c   :  { %3164 = vmatmul.mubr.msk.f32.vlgmr.msra.gmra.mrb[6].mxu1 %vm507_vm5, %v506_v36 }
 0x36d   :  { %3168 = vmatprep.mubr.msk.bf16.mxu1 %vm3685_vm0, %v3684_v0 }
 0x43f   :  { %v577_v41 = vpop.f32.mrb[6].mxu1 }
 0x440   :  { %v584_v42 = vrot.slane %v577_v41, %v3804_v39  ;;  %v3165_v43 = vpop.f32.mrb[7].mxu1  ;;  %v590_v46 = vrot.slane %v577_v41, %v3806_v40 }
 0x442   :  { %v585_v44 = vmul.f32 %v584_v42, %v376_v58  ;;  %v586_v45 = vmul.f32 %v584_v42, %v379_v61  ;;  %v3515_v58 = vld [vmem:[#allocation2 + $0x80] sm:$0xff]   ;;  %v3518_v61 = vld [vmem:[#allocation2 + $0xd0] sm:$0xff]  }
 0x444   :  { %v591_v47 = vadd.f32 %v590_v46, %v585_v44  ;;  %v592_v49 = vadd.f32 %v590_v46, %v586_v45  ;;  %v965_v45 = vld [vmem:[#allocation5 + $0x80] sm:$0xff]  ;;  %v966_v46 = vld [vmem:[#allocation5 + $0x88] sm:$0xff] }
 0x446   :  { %v593_v50 = vmax.f32 %v591_v47, 0.0  ;;  %v594_v51 = vmax.f32 %v592_v49, 0.0  ;;  %v3410_v47 = vpack.c.bf16 %v966_v46, %v965_v45  ;;  %v967_v49 = vld [vmem:[#allocation5 + $0x90] sm:$0xff] }
 0x448   :  { %v595_v52 = vpack.c.bf16 %v594_v51, %v593_v50  ;;  %v968_v50 = vld [vmem:[#allocation5 + $0x98] sm:$0xff] }
 0x449   :  { %v3413_v51 = vpack.c.bf16 %v968_v50, %v967_v49 }
 0x44a   :  { %3167 = vmatpush3.bf16.msra.mxu1 %v595_v52  ;;  %3179 = vmatpush3.bf16.msra.mxu0 %v595_v52 }
 0x44b   :  { %3172 = vmatprep.subr.bf16.mxu1 %v3684_v0  ;;  %2893 = vmatprep.subr.bf16.mxu0 %v3514_v57 }
 0x44d   :  { %3169 = vmatmul.mubr.msk.bf16.vlgmr.msra.gmra.mrb[8].mxu1 %vm597_vm6, %v596_v53  ;;  %3181 = vmatmul.mubr.msk.bf16.vlgmr.msra.gmra.mrb[16].mxu0 %vm597_vm6, %v687_v54  ;;  %v970_v53 = vld [vmem:[#allocation5 + $0xa8] sm:$0xff] }
 0x44e   :  { %3173 = vmatpush3.bf16.msra.mxu1 %v595_v52  ;;  %3174 = vmatprep.mubr.msk.bf16.mxu1 %vm3685_vm0, %v3684_v0 }
 0x44f   :  { %3184 = vmatprep.subr.bf16.mxu1 %v3684_v0  ;;  %2894 = vmatpush3.bf16.msra.mxu0 %v3515_v58  ;;  %v973_v58 = vld [vmem:[#allocation5 + $0xc0] sm:$0xff] }
 0x450   :  { %2895 = vmatprep.subr.bf16.mxu0 %v3516_v59  ;;  %v974_v59 = vld [vmem:[#allocation5 + $0xc8] sm:$0xff] }
 0x453   :  { %2896 = vmatpush3.bf16.msra.mxu0 %v3517_v60  ;;  %v3422_v60 = vpack.c.bf16 %v974_v59, %v973_v58  ;;  %v3537_v58 = vld [vmem:[#allocation2 + $0x1a0] sm:$0xff]   ;;  %v3532_v59 = vld [vmem:[#allocation2 + $0x168] sm:$0xff]  }
 0x454   :  { %2897 = vmatprep.subr.bf16.mxu0 %v3518_v61 }
 0x455   :  { %3175 = vmatmul.mubr.msk.bf16.vlgmr.msra.gmra.mrb[12].mxu1 %vm597_vm6, %v642_v55  ;;  %v971_v55 = vld [vmem:[#allocation5 + $0xb0] sm:$0xff] }
 0x456   :  { %3185 = vmatpush3.bf16.msra.mxu1 %v595_v52  ;;  %3186 = vmatprep.mubr.msk.bf16.mxu1 %vm3685_vm0, %v3684_v0  ;;  %v969_v52 = vld [vmem:[#allocation5 + $0xa0] sm:$0xff] }
 0x457   :  { %3400 = vmatprep.subr.bf16.mxu1 %v3688_v48  ;;  %2898 = vmatpush3.bf16.msra.mxu0 %v3519_v62  ;;  %v3416_v54 = vpack.c.bf16 %v970_v53, %v969_v52  ;;  %v1217_v52 = vld [vmem:[#allocation2 + $0x108] sm:$0x3]  ;;  %v3530_v53 = vld [vmem:[#allocation2 + $0x160] sm:$0xff]  }
 0x458   :  { %2899 = vmatprep.subr.bf16.mxu0 %v3520_v63 }
 0x45b   :  { %2900 = vmatpush3.bf16.msra.mxu0 %v3521_v1 }
 0x45c   :  { %2901 = vmatprep.subr.bf16.mxu0 %v3522_v2 }
 0x45d   :  { %3187 = vmatmul.mubr.msk.bf16.vlgmr.msra.gmra.mrb[16].mxu1 %vm597_vm6, %v732_v56  ;;  %v972_v56 = vld [vmem:[#allocation5 + $0xb8] sm:$0xff] }
 0x45e   :  { %3222 = vmatprep.mubr.msk.f32.mxu1 %vm3685_vm0, %v3684_v0  ;;  %3402 = vmatpush3.bf16.msra.mxu1 %v3401_v24  ;;  %v3419_v57 = vpack.c.bf16 %v972_v56, %v971_v55  ;;  %v1262_v55 = vld [vmem:[#allocation2 + $0x110] sm:$0x3]  ;;  %v1307_v56 = vld [vmem:[#allocation2 + $0x118] sm:$0x3] }
 0x45f   :  { %2902 = vmatpush3.bf16.msra.mxu0 %v3523_v3  ;;  %3403 = vmatprep.subr.bf16.mxu1 %v3688_v48 }
 0x460   :  { %2903 = vmatprep.subr.bf16.mxu0 %v3524_v4 }
 0x462   :  { %3405 = vmatpush3.bf16.msra.mxu1 %v3404_v28 }
 0x463   :  { %2904 = vmatpush3.bf16.msra.mxu0 %v3525_v5  ;;  %3406 = vmatprep.subr.bf16.mxu1 %v3688_v48 }
 0x464   :  { %2905 = vmatprep.subr.bf16.mxu0 %v3526_v6 }
 0x466   :  { %3408 = vmatpush3.bf16.msra.mxu1 %v3407_v31 }
 0x467   :  { %2906 = vmatpush3.bf16.msra.mxu0 %v3527_v7  ;;  %3409 = vmatprep.subr.bf16.mxu1 %v3688_v48 }
 0x468   :  { %2907 = vmatprep.subr.bf16.mxu0 %v3528_v8 }
 0x46a   :  { %3411 = vmatpush3.bf16.msra.mxu1 %v3410_v47 }
 0x46b   :  { %2908 = vmatpush3.bf16.msra.mxu0 %v3529_v13  ;;  %3412 = vmatprep.subr.bf16.mxu1 %v3688_v48 }
 0x46c   :  { %3424 = vmatprep.subr.bf16.mxu0 %v3688_v48 }
 0x46e   :  { %3414 = vmatpush3.bf16.msra.mxu1 %v3413_v51  ;;  %v1168_v51 = vld [vmem:[#allocation2 + $0x100] sm:$0x3] }
 0x46f   :  { %3415 = vmatprep.subr.bf16.mxu1 %v3688_v48 }
 0x472   :  { %3417 = vmatpush3.bf16.msra.mxu1 %v3416_v54  ;;  %v3535_v54 = vld [vmem:[#allocation2 + $0x1e0] sm:$0xff]  }
 0x473   :  { %3418 = vmatprep.subr.bf16.mxu1 %v3688_v48 }
 0x476   :  { %3420 = vmatpush3.bf16.msra.mxu1 %v3419_v57  ;;  %v3531_v57 = vld [vmem:[#allocation2 + $0x120] sm:$0xff]  }
 0x477   :  { %3421 = vmatprep.subr.bf16.mxu1 %v3688_v48 }
 0x47a   :  { %3423 = vmatpush3.bf16.msra.mxu1 %v3422_v60  ;;  %v3539_v60 = vld [vmem:[#allocation2 + $0x1e8] sm:$0xff]  }
 0x47b   :  { %3236 = vmatprep.subr.bf16.mxu1 %v3684_v0 }
 0x520   :  { %v635_v9 = vpop.f32.mrb[8].mxu1  ;;  %v725_v10 = vpop.f32.mrb[16].mxu0 }
 0x521   :  { %v3170_v11 = vpop.f32.mrb[9].mxu1  ;;  %v3182_v12 = vpop.f32.mrb[17].mxu0  ;;  %v731_v37 = vpack.c.bf16 %v725_v10, %v725_v10  ;;  %v641_v41 = vpack.c.bf16 %v635_v9, %v635_v9 }
 0x522   :  { %v638_v14 = vpop.f32.mrb[10].mxu1  ;;  %v728_v15 = vpop.f32.mrb[18].mxu0 }
 0x523   :  { %v3171_v16 = vpop.f32.mrb[11].mxu1  ;;  %v3183_v17 = vpop.f32.mrb[19].mxu0 }
 0x524   :  { %v975_v17 = vld [vmem:[#allocation5 + $0xd0] sm:$0xff] }
 0x528   :  { %v680_v18 = vpop.f32.mrb[12].mxu1 }
 0x529   :  { %v686_v22 = vpack.c.bf16 %v680_v18, %v680_v18  ;;  %v3176_v23 = vpop.f32.mrb[13].mxu1  ;;  %v976_v18 = vld [vmem:[#allocation5 + $0xd8] sm:$0xff] }
 0x52a   :  { %v683_v26 = vpop.f32.mrb[14].mxu1  ;;  %v3425_v19 = vpack.c.bf16 %v976_v18, %v975_v17  ;;  %v3555_v17 = vld [vmem:[#allocation2 + $0x208] sm:$0xff]   ;;  %v3556_v18 = vld [vmem:[#allocation2 + $0x158] sm:$0xff]  }
 0x52b   :  { %778 = vrot.lane.b32.xlu0 %v686_v22, %s3679_s22  ;;  %v3177_v27 = vpop.f32.mrb[15].mxu1  ;;  %v3428_v22 = vpack.c.bf16 %v978_v21, %v977_v20  ;;  %v3558_v20 = vld [vmem:[#allocation2 + $0x210] sm:$0xff]  }
 0x52c   :  { %v3559_v21 = vld [vmem:[#allocation2 + $0x1d0] sm:$0xff]  }
 0x530   :  { %v770_v32 = vpop.f32.mrb[16].mxu1 }
 0x531   :  { %v776_v33 = vpack.c.bf16 %v770_v32, %v770_v32  ;;  %v3188_v34 = vpop.f32.mrb[17].mxu1  ;;  %v979_v32 = vld [vmem:[#allocation5 + $0xf0] sm:$0x3] }
 0x532   :  { %v773_v35 = vpop.f32.mrb[18].mxu1 }
 0x533   :  { %781 = vrot.lane.b32.xlu1 %v776_v33, %s3679_s22  ;;  %v3189_v36 = vpop.f32.mrb[19].mxu1  ;;  %s3650_s22 = scalar_lea.vmem %s2724_s21, 32 }
 0x534   :  { %p3651_p2 = scmp.ne.s32.totalorder %s2724_s21, %s3650_s22  ;;  %p3656_p4 = scmp.lt.s32.totalorder %s3650_s22, %s3650_s22 }
 0x536   :  { %p3657_p5 = por %p3656_p4, %p3655_p3 }
 0x538   :  { %p3658_p6 = pnand %p3657_p5, %p3651_p2 }
 0x59d   :  { %v779_v38 = vpop.permute.xlu0 %778 }
 0x59e   :  { %v785_v44 = vsel %vm271_vm2, %v641_v41, %v779_v38 }
 0x5a5   :  { %v782_v42 = vpop.permute.xlu1 %781 }
 0x5a6   :  { %v789_v43 = vsel %vm271_vm2, %v731_v37, %v782_v42 }
 0x5a7   :  { %951 = vmatprep.mubr.bf16.mxu0 %v789_v43 }
 0x5a8   :  { %952 = vmatmul.mubr.bf16.vlgmr.msra.gmra.mrb[20].mxu0 %v785_v44 }
 0x5a9   :  { %3233 = vmatprep.mubr.msk.f32.mxu0 %vm3685_vm0, %v3684_v0  ;;  %3426 = vmatpush3.bf16.msra.mxu0 %v3425_v19  ;;  %v3557_v19 = vld [vmem:[#allocation2 + $0x1c8] sm:$0xff]  }
 0x5aa   :  { %3427 = vmatprep.subr.bf16.mxu0 %v3688_v48 }
 0x5ad   :  { %3429 = vmatpush3.bf16.msra.mxu0 %v3428_v22  ;;  %v3560_v22 = vld [vmem:[#allocation2 + $0x218] sm:$0xff]  }
 0x5ae   :  { %3242 = vmatprep.subr.bf16.mxu0 %v3684_v0 }
 0x67b   :  { %v2909_v61 = vpop.f32.mrb[20].mxu0 }
 0x67c   :  { %v2910_v62 = vpop.f32.mrb[21].mxu0 }
 0x67d   :  { %v2911_v63 = vadd.f32 %v2910_v62, %v2909_v61  ;;  %v2912_v1 = vpop.f32.mrb[22].mxu0  ;;  %v3533_v61 = vld [vmem:[#allocation2 + $0x128] sm:$0xff]  }
 0x67e   :  { %v2913_v2 = vpop.f32.mrb[23].mxu0  ;;  %v3541_v62 = vld [vmem:[#allocation2 + $0x1a8] sm:$0xff]   ;;  %v3543_v1 = vld [vmem:[#allocation2 + $0x1f0] sm:$0xff]  }
 0x67f   :  { %v980_v3 = vrot.slane %v2911_v63, 4  ;;  %v986_v4 = vmul.f32 %v2911_v63, %v2911_v63  ;;  %v3536_v2 = vld [vmem:[#allocation2 + $0x130] sm:$0xff]  }
 0x681   :  { %v981_v5 = vadd.f32 %v2911_v63, %v980_v3  ;;  %v987_v6 = vrot.slane %v986_v4, 4  ;;  %v3545_v3 = vld [vmem:[#allocation2 + $0x1b0] sm:$0xff]  }
 0x683   :  { %v982_v7 = vrot.slane %v981_v5, 2  ;;  %v988_v8 = vadd.f32 %v987_v6, %v986_v4  ;;  %v3538_v4 = vld [vmem:[#allocation2 + $0x178] sm:$0xff]  }
 0x684   :  { %v3540_v6 = vld [vmem:[#allocation2 + $0x138] sm:$0xff]  }
 0x685   :  { %v983_v9 = vadd.f32 %v982_v7, %v981_v5  ;;  %v989_v10 = vrot.slane %v988_v8, 2  ;;  %v3547_v5 = vld [vmem:[#allocation2 + $0x1f8] sm:$0xff]  }
 0x686   :  { %v3549_v7 = vld [vmem:[#allocation2 + $0x1b8] sm:$0xff]  }
 0x687   :  { %v984_v11 = vrot.slane %v983_v9, 1  ;;  %v990_v12 = vadd.f32 %v989_v10, %v988_v8  ;;  %v3542_v8 = vld [vmem:[#allocation2 + $0x180] sm:$0xff]  }
 0x688   :  { %v3544_v10 = vld [vmem:[#allocation2 + $0x140] sm:$0xff]  }
 0x689   :  { %v991_v13 = vrot.slane %v990_v12, 1  ;;  %v985_v14 = vadd.f32 %v984_v11, %v983_v9  ;;  %v3551_v9 = vld [vmem:[#allocation2 + $0x200] sm:$0xff]  }
 0x68a   :  { %v3553_v11 = vld [vmem:[#allocation2 + $0x1c0] sm:$0xff]  }
 0x68b   :  { %v992_v15 = vadd.f32 %v991_v13, %v990_v12  ;;  %v3546_v12 = vld [vmem:[#allocation2 + $0x188] sm:$0xff]  }
 0x68c   :  { %v3548_v13 = vld [vmem:[#allocation2 + $0x148] sm:$0xff]  }
 0x68d   :  { %v993_v16 = vsel %vm413_vm4, %v985_v14, %v992_v15  ;;  %v3550_v14 = vld [vmem:[#allocation2 + $0x190] sm:$0xff]  }
 0x68e   :  { %3223 = vmatmul.mubr.f32.vlgmr.msra.gmra.mrb[20].mxu1 %v993_v16  ;;  %v3552_v15 = vld [vmem:[#allocation2 + $0x150] sm:$0xff]   ;;  %v3554_v16 = vld [vmem:[#allocation2 + $0x198] sm:$0xff]  }
 0x68f   :  { %3238 = vmatprep.mubr.msk.bf16.mxu1 %vm3685_vm0, %v3684_v0 }
 0x761   :  { %v1060_v23 = vpop.f32.mrb[20].mxu1 }
 0x762   :  { %v1064_v24 = vmul.f32 0.03125, %v1060_v23  ;;  %v3224_v25 = vpop.f32.mrb[21].mxu1  ;;  %v3561_v23 = vld [vmem:[#allocation2 + $0x1d8] sm:$0xff]  }
 0x763   :  { %v1689_v25 = vld [vmem:[#allocation5 + $0x100] sm:$0xff] }
 0x764   :  { %v1065_v26 = vmul.f32 %v1064_v24, %v1064_v24 }
 0x766   :  { %v1067_v27 = vrot.slane %v1065_v26, 7 }
 0x768   :  { %v1069_v28 = vsub.f32 %v1064_v24, %v1067_v27 }
 0x76a   :  { %v1070_v29 = vmax.f32 %v1069_v28, 0.0 }
 0x76c   :  { %v1071_v30 = vadd.f32 1e-05, %v1070_v29 }
 0x76e   :  { %3600 = vrsqrt.f32 %v1071_v30 }
 0x778   :  { %v3601_v31 = vpop.eup %3600 }
 0x779   :  { %v1074_v33 = vrot.slane %v3601_v31, 1 }
 0x77b   :  { %v1076_v34 = vmul.f32 %v1074_v33, %v979_v32 }
 0x77d   :  { %v1077_v35 = vmul.f32 %v1076_v34, %v1064_v24  ;;  %v1688_v24 = vld [vmem:[#allocation5 + $0xf8] sm:$0xff] }
 0x77f   :  { %v1079_v36 = vrot.slane %v1077_v35, 7 }
 0x781   :  { %v1081_v37 = vsub.f32 %v979_v32, %v1079_v36  ;;  %v3431_v32 = vpack.c.bf16 %v1689_v25, %v1688_v24 }
 0x783   :  { %v1082_v38 = vsel %vm413_vm4, %v1076_v34, %v1081_v37 }
 0x784   :  { %3234 = vmatmul.mubr.msk.f32.vlgmr.msra.gmra.mrb[24].mxu0 %vm57_vm1, %v1082_v38 }
 0x785   :  { %3244 = vmatprep.mubr.msk.bf16.mxu0 %vm3685_vm0, %v3684_v0 }
 0x857   :  { %v1152_v41 = vpop.f32.mrb[24].mxu0 }
 0x858   :  { %v1159_v42 = vrot.slane %v1152_v41, %v3804_v39  ;;  %v3235_v43 = vpop.f32.mrb[25].mxu0  ;;  %v1164_v45 = vrot.slane %v1152_v41, %v3806_v40 }
 0x85a   :  { %v1160_v44 = vmul.f32 %v2911_v63, %v1159_v42  ;;  %v3534_v63 = vld [vmem:[#allocation2 + $0x170] sm:$0xff]  }
 0x85c   :  { %v1165_v46 = vadd.f32 %v1164_v45, %v1160_v44 }
 0x85e   :  { %v1166_v47 = vmax.f32 %v1165_v46, 0.0 }
 0x860   :  { %v1167_v49 = vpack.c.bf16 %v1166_v47, %v1166_v47 }
 0x862   :  { %v1174_v50 = vsel %vm1172_vm7, %v1167_v49, 0 }
 0x863   :  { %3237 = vmatpush3.bf16.msra.mxu1 %v1174_v50  ;;  %3243 = vmatpush3.bf16.msra.mxu0 %v1174_v50 }
 0x864   :  { %3248 = vmatprep.subr.bf16.mxu1 %v3684_v0  ;;  %3254 = vmatprep.subr.bf16.mxu0 %v3684_v0 }
 0x866   :  { %3239 = vmatmul.mubr.msk.bf16.vlgmr.msra.gmra.mrb[24].mxu1 %vm507_vm5, %v1168_v51  ;;  %3245 = vmatmul.mubr.msk.bf16.vlgmr.msra.gmra.mrb[28].mxu0 %vm507_vm5, %v1217_v52  ;;  %v1691_v51 = vld [vmem:[#allocation5 + $0x110] sm:$0xff] }
 0x867   :  { %3249 = vmatpush3.bf16.msra.mxu1 %v1174_v50  ;;  %3255 = vmatpush3.bf16.msra.mxu0 %v1174_v50  ;;  %v1690_v50 = vld [vmem:[#allocation5 + $0x108] sm:$0xff] }
 0x868   :  { %3250 = vmatprep.mubr.msk.bf16.mxu1 %vm3685_vm0, %v3684_v0  ;;  %3256 = vmatprep.mubr.msk.bf16.mxu0 %vm3685_vm0, %v3684_v0  ;;  %v3434_v52 = vpack.c.bf16 %v1691_v51, %v1690_v50 }
 0x869   :  { %2945 = vmatprep.subr.bf16.mxu1 %v3530_v53  ;;  %2967 = vmatprep.subr.bf16.mxu0 %v3535_v54  ;;  %v1692_v53 = vld [vmem:[#allocation5 + $0x118] sm:$0xff]  ;;  %v1693_v54 = vld [vmem:[#allocation5 + $0x120] sm:$0xff] }
 0x86e   :  { %3251 = vmatmul.mubr.msk.bf16.vlgmr.msra.gmra.mrb[28].mxu1 %vm507_vm5, %v1262_v55  ;;  %3257 = vmatmul.mubr.msk.bf16.vlgmr.msra.gmra.mrb[32].mxu0 %vm507_vm5, %v1307_v56  ;;  %v3437_v55 = vpack.c.bf16 %v1693_v54, %v1692_v53  ;;  %v1694_v56 = vld [vmem:[#allocation5 + $0x128] sm:$0xff] }
 0x86f   :  { %2946 = vmatpush3.bf16.msra.mxu1 %v3531_v57  ;;  %2968 = vmatpush3.bf16.msra.mxu0 %v3537_v58  ;;  %v1695_v57 = vld [vmem:[#allocation5 + $0x130] sm:$0xff] }
 0x870   :  { %2947 = vmatprep.subr.bf16.mxu1 %v3532_v59  ;;  %2969 = vmatprep.subr.bf16.mxu0 %v3539_v60  ;;  %v3440_v58 = vpack.c.bf16 %v1695_v57, %v1694_v56  ;;  %v1696_v59 = vld [vmem:[#allocation5 + $0x138] sm:$0xff]  ;;  %v1697_v60 = vld [vmem:[#allocation5 + $0x140] sm:$0xff] }
 0x873   :  { %2948 = vmatpush3.bf16.msra.mxu1 %v3533_v61  ;;  %2970 = vmatpush3.bf16.msra.mxu0 %v3541_v62  ;;  %v3443_v61 = vpack.c.bf16 %v1697_v60, %v1696_v59  ;;  %v1698_v62 = vld [vmem:[#allocation5 + $0x148] sm:$0xff]  ;;  %v1712_v59 = vld [vmem:[#allocation5 + $0x1b8] sm:$0x3] }
 0x874   :  { %2949 = vmatprep.subr.bf16.mxu1 %v3534_v63  ;;  %2971 = vmatprep.subr.bf16.mxu0 %v3543_v1  ;;  %v1699_v63 = vld [vmem:[#allocation5 + $0x150] sm:$0xff] }
 0x875   :  { %v3446_v1 = vpack.c.bf16 %v1699_v63, %v1698_v62 }
 0x877   :  { %2950 = vmatpush3.bf16.msra.mxu1 %v3536_v2  ;;  %2972 = vmatpush3.bf16.msra.mxu0 %v3545_v3  ;;  %v1700_v2 = vld [vmem:[#allocation5 + $0x158] sm:$0xff]  ;;  %v1701_v3 = vld [vmem:[#allocation5 + $0x160] sm:$0xff] }
 0x878   :  { %2951 = vmatprep.subr.bf16.mxu1 %v3538_v4  ;;  %2973 = vmatprep.subr.bf16.mxu0 %v3547_v5  ;;  %v3449_v4 = vpack.c.bf16 %v1701_v3, %v1700_v2  ;;  %v1702_v5 = vld [vmem:[#allocation5 + $0x168] sm:$0xff] }
 0x87b   :  { %2952 = vmatpush3.bf16.msra.mxu1 %v3540_v6  ;;  %2974 = vmatpush3.bf16.msra.mxu0 %v3549_v7  ;;  %v1703_v6 = vld [vmem:[#allocation5 + $0x170] sm:$0xff] }
 0x87c   :  { %2953 = vmatprep.subr.bf16.mxu1 %v3542_v8  ;;  %2975 = vmatprep.subr.bf16.mxu0 %v3551_v9  ;;  %v3452_v7 = vpack.c.bf16 %v1703_v6, %v1702_v5 }
 0x87f   :  { %2954 = vmatpush3.bf16.msra.mxu1 %v3544_v10  ;;  %2976 = vmatpush3.bf16.msra.mxu0 %v3553_v11 }
 0x880   :  { %2955 = vmatprep.subr.bf16.mxu1 %v3546_v12  ;;  %2977 = vmatprep.subr.bf16.mxu0 %v3555_v17 }
 0x883   :  { %2956 = vmatpush3.bf16.msra.mxu1 %v3548_v13  ;;  %2978 = vmatpush3.bf16.msra.mxu0 %v3557_v19 }
 0x884   :  { %2957 = vmatprep.subr.bf16.mxu1 %v3550_v14  ;;  %2979 = vmatprep.subr.bf16.mxu0 %v3558_v20 }
 0x887   :  { %2958 = vmatpush3.bf16.msra.mxu1 %v3552_v15  ;;  %2980 = vmatpush3.bf16.msra.mxu0 %v3559_v21 }
 0x888   :  { %2959 = vmatprep.subr.bf16.mxu1 %v3554_v16  ;;  %2981 = vmatprep.subr.bf16.mxu0 %v3560_v22 }
 0x88b   :  { %2960 = vmatpush3.bf16.msra.mxu1 %v3556_v18  ;;  %2982 = vmatpush3.bf16.msra.mxu0 %v3561_v23 }
 0x88c   :  { %3430 = vmatprep.subr.bf16.mxu1 %v3688_v48  ;;  %3454 = vmatprep.subr.bf16.mxu0 %v3688_v48 }
 0x939   :  { %v1210_v26 = vpop.f32.mrb[24].mxu1  ;;  %v1255_v27 = vpop.f32.mrb[28].mxu0 }
 0x93a   :  { %v1216_v28 = vpack.c.bf16 %v1210_v26, %v1210_v26  ;;  %v1261_v29 = vpack.c.bf16 %v1255_v27, %v1255_v27  ;;  %v3240_v30 = vpop.f32.mrb[25].mxu1  ;;  %v3246_v31 = vpop.f32.mrb[29].mxu0 }
 0x93b   :  { %v1213_v33 = vpop.f32.mrb[26].mxu1  ;;  %v1258_v34 = vpop.f32.mrb[30].mxu0 }
 0x93c   :  { %v3241_v35 = vpop.f32.mrb[27].mxu1  ;;  %v3247_v36 = vpop.f32.mrb[31].mxu0  ;;  %1640 = vmatprep.mubr.bf16.mxu1 %v1261_v29 }
 0x93d   :  { %1641 = vmatmul.mubr.bf16.vlgmr.msra.gmra.mrb[32].mxu1 %v1216_v28  ;;  %v1704_v35 = vld [vmem:[#allocation5 + $0x178] sm:$0xff]  ;;  %v1705_v36 = vld [vmem:[#allocation5 + $0x180] sm:$0xff] }
 0x93e   :  { %3432 = vmatpush3.bf16.msra.mxu1 %v3431_v32  ;;  %3292 = vmatprep.mubr.msk.f32.mxu1 %vm3685_vm0, %v3684_v0 }
 0x93f   :  { %3433 = vmatprep.subr.bf16.mxu1 %v3688_v48 }
 0x941   :  { %v1300_v37 = vpop.f32.mrb[28].mxu1  ;;  %v1345_v38 = vpop.f32.mrb[32].mxu0 }
 0x942   :  { %v1306_v41 = vpack.c.bf16 %v1300_v37, %v1300_v37  ;;  %v1351_v42 = vpack.c.bf16 %v1345_v38, %v1345_v38  ;;  %v3252_v43 = vpop.f32.mrb[29].mxu1  ;;  %v3258_v44 = vpop.f32.mrb[33].mxu0  ;;  %3435 = vmatpush3.bf16.msra.mxu1 %v3434_v52  ;;  %v3455_v37 = vpack.c.bf16 %v1705_v36, %v1704_v35  ;;  %v1706_v38 = vld [vmem:[#allocation5 + $0x188] sm:$0xff]  ;;  %v3581_v35 = vld [vmem:[#allocation2 + $0x2d8] sm:$0xff]   ;;  %v3582_v36 = vld [vmem:[#allocation2 + $0x2b0] sm:$0xff]  }
 0x943   :  { %v1303_v45 = vpop.f32.mrb[30].mxu1  ;;  %v1348_v46 = vpop.f32.mrb[34].mxu0  ;;  %3436 = vmatprep.subr.bf16.mxu1 %v3688_v48  ;;  %v1708_v43 = vld [vmem:[#allocation5 + $0x198] sm:$0xff]  ;;  %v1709_v44 = vld [vmem:[#allocation5 + $0x1a0] sm:$0xff] }
 0x944   :  { %v3253_v47 = vpop.f32.mrb[31].mxu1  ;;  %v3259_v49 = vpop.f32.mrb[35].mxu0  ;;  %1680 = vmatprep.mubr.bf16.mxu0 %v1351_v42  ;;  %v3461_v45 = vpack.c.bf16 %v1709_v44, %v1708_v43  ;;  %v1710_v46 = vld [vmem:[#allocation5 + $0x1a8] sm:$0xff]  ;;  %v3588_v44 = vld [vmem:[#allocation2 + $0x278] sm:$0xff]  }
 0x945   :  { %1681 = vmatmul.mubr.bf16.vlgmr.msra.gmra.mrb[36].mxu0 %v1306_v41  ;;  %v1707_v41 = vld [vmem:[#allocation5 + $0x190] sm:$0xff]  ;;  %v3587_v43 = vld [vmem:[#allocation2 + $0x328] sm:$0xff]  }
 0x946   :  { %3311 = vmatprep.mubr.msk.f32.mxu0 %vm3685_vm0, %v3684_v0  ;;  %3438 = vmatpush3.bf16.msra.mxu1 %v3437_v55  ;;  %v3458_v42 = vpack.c.bf16 %v1707_v41, %v1706_v38  ;;  %v1711_v47 = vld [vmem:[#allocation5 + $0x1b0] sm:$0xff]  ;;  %v3585_v41 = vld [vmem:[#allocation2 + $0x2e0] sm:$0xff]  }
 0x947   :  { %3439 = vmatprep.subr.bf16.mxu1 %v3688_v48  ;;  %3456 = vmatpush3.bf16.msra.mxu0 %v3455_v37  ;;  %v3464_v49 = vpack.c.bf16 %v1711_v47, %v1710_v46  ;;  %v3583_v37 = vld [vmem:[#allocation2 + $0x320] sm:$0xff]   ;;  %v3584_v38 = vld [vmem:[#allocation2 + $0x270] sm:$0xff]  }
 0x948   :  { %3457 = vmatprep.subr.bf16.mxu0 %v3688_v48  ;;  %v3590_v46 = vld [vmem:[#allocation2 + $0x330] sm:$0xff]  }
 0x949   :  { %v3591_v47 = vld [vmem:[#allocation2 + $0x2f0] sm:$0xff]  }
 0x94a   :  { %3441 = vmatpush3.bf16.msra.mxu1 %v3440_v58 }
 0x94b   :  { %3442 = vmatprep.subr.bf16.mxu1 %v3688_v48  ;;  %3459 = vmatpush3.bf16.msra.mxu0 %v3458_v42  ;;  %v3586_v42 = vld [vmem:[#allocation2 + $0x2b8] sm:$0xff]  }
 0x94c   :  { %3460 = vmatprep.subr.bf16.mxu0 %v3688_v48 }
 0x94e   :  { %3444 = vmatpush3.bf16.msra.mxu1 %v3443_v61 }
 0x94f   :  { %3445 = vmatprep.subr.bf16.mxu1 %v3688_v48  ;;  %3462 = vmatpush3.bf16.msra.mxu0 %v3461_v45  ;;  %v3589_v45 = vld [vmem:[#allocation2 + $0x2e8] sm:$0xff]  }
 0x950   :  { %3463 = vmatprep.subr.bf16.mxu0 %v3688_v48 }
 0x952   :  { %3447 = vmatpush3.bf16.msra.mxu1 %v3446_v1 }
 0x953   :  { %3448 = vmatprep.subr.bf16.mxu1 %v3688_v48  ;;  %3465 = vmatpush3.bf16.msra.mxu0 %v3464_v49  ;;  %v3592_v49 = vld [vmem:[#allocation2 + $0x338] sm:$0xff]  }
 0x954   :  { %3314 = vmatprep.subr.bf16.mxu0 %v3684_v0 }
 0x956   :  { %3450 = vmatpush3.bf16.msra.mxu1 %v3449_v4 }
 0x957   :  { %3451 = vmatprep.subr.bf16.mxu1 %v3688_v48 }
 0x95a   :  { %3453 = vmatpush3.bf16.msra.mxu1 %v3452_v7 }
 0x95b   :  { %3326 = vmatprep.subr.bf16.mxu1 %v3684_v0 }
 0xa10   :  { %v2961_v8 = vpop.f32.mrb[32].mxu1 }
 0xa11   :  { %v2962_v9 = vpop.f32.mrb[33].mxu1 }
 0xa12   :  { %v2963_v10 = vadd.f32 %v2962_v9, %v2961_v8  ;;  %v2964_v11 = vpop.f32.mrb[34].mxu1 }
 0xa13   :  { %v2965_v12 = vpop.f32.mrb[35].mxu1  ;;  %v3562_v11 = vld [vmem:[#allocation2 + $0x280] sm:$0xff]  }
 0xa18   :  { %v2983_v13 = vpop.f32.mrb[36].mxu0 }
 0xa19   :  { %v2984_v14 = vpop.f32.mrb[37].mxu0 }
 0xa1a   :  { %v2985_v15 = vadd.f32 %v2984_v14, %v2983_v13  ;;  %v2986_v16 = vpop.f32.mrb[38].mxu0  ;;  %v1903_v13 = vld [vmem:[#allocation2 + $0x220] sm:$0x1]  ;;  %v1998_v14 = vld [vmem:[#allocation2 + $0x230] sm:$0x1] }
 0xa1b   :  { %v2987_v17 = vpop.f32.mrb[39].mxu0  ;;  %v3564_v16 = vld [vmem:[#allocation2 + $0x288] sm:$0xff]  }
 0xa1c   :  { %v1683_v18 = vadd.f32 %v2985_v15, %v2963_v10  ;;  %v3563_v15 = vld [vmem:[#allocation2 + $0x240] sm:$0xff]   ;;  %v3565_v17 = vld [vmem:[#allocation2 + $0x248] sm:$0xff]  }
 0xa1e   :  { %v1713_v19 = vsel %vm1172_vm7, %v1683_v18, 0.0  ;;  %v1720_v20 = vmul.f32 %v1683_v18, %v1683_v18 }
 0xa1f   :  { %v1714_v21 = vrot.slane %v1713_v19, 4 }
 0xa20   :  { %v1721_v22 = vsel %vm1172_vm7, %v1720_v20, 0.0  ;;  %v3567_v20 = vld [vmem:[#allocation2 + $0x300] sm:$0xff]  }
 0xa21   :  { %v1715_v23 = vadd.f32 %v1714_v21, %v1713_v19  ;;  %v1722_v24 = vrot.slane %v1721_v22, 4  ;;  %v1953_v19 = vld [vmem:[#allocation2 + $0x228] sm:$0x1]  ;;  %v3568_v21 = vld [vmem:[#allocation2 + $0x250] sm:$0xff]  }
 0xa23   :  { %v1716_v25 = vrot.slane %v1715_v23, 2  ;;  %v1723_v26 = vadd.f32 %v1722_v24, %v1721_v22  ;;  %v3570_v22 = vld [vmem:[#allocation2 + $0x298] sm:$0xff]   ;;  %v3574_v24 = vld [vmem:[#allocation2 + $0x2a0] sm:$0xff]  }
 0xa25   :  { %v1717_v27 = vadd.f32 %v1716_v25, %v1715_v23  ;;  %v1724_v28 = vrot.slane %v1723_v26, 2  ;;  %v3572_v23 = vld [vmem:[#allocation2 + $0x258] sm:$0xff]  }
 0xa26   :  { %v2043_v25 = vld [vmem:[#allocation2 + $0x238] sm:$0x1] }
 0xa27   :  { %v1718_v29 = vrot.slane %v1717_v27, 1  ;;  %v1725_v30 = vadd.f32 %v1724_v28, %v1723_v26  ;;  %v3569_v26 = vld [vmem:[#allocation2 + $0x2c0] sm:$0xff]  }
 0xa28   :  { %v3576_v28 = vld [vmem:[#allocation2 + $0x260] sm:$0xff]  }
 0xa29   :  { %v1726_v31 = vrot.slane %v1725_v30, 1  ;;  %v1719_v32 = vadd.f32 %v1718_v29, %v1717_v27  ;;  %v3571_v27 = vld [vmem:[#allocation2 + $0x308] sm:$0xff]  }
 0xa2a   :  { %v3573_v29 = vld [vmem:[#allocation2 + $0x2c8] sm:$0xff]  }
 0xa2b   :  { %v1727_v33 = vadd.f32 %v1726_v31, %v1725_v30  ;;  %v3575_v30 = vld [vmem:[#allocation2 + $0x310] sm:$0xff]  }
 0xa2c   :  { %v3577_v31 = vld [vmem:[#allocation2 + $0x2d0] sm:$0xff]  }
 0xa2d   :  { %v1728_v34 = vsel %vm413_vm4, %v1719_v32, %v1727_v33  ;;  %v3578_v32 = vld [vmem:[#allocation2 + $0x2a8] sm:$0xff]   ;;  %v3579_v33 = vld [vmem:[#allocation2 + $0x318] sm:$0xff]  }
 0xa2e   :  { %3293 = vmatmul.mubr.f32.vlgmr.msra.gmra.mrb[22].mxu1 %v1728_v34  ;;  %v3580_v34 = vld [vmem:[#allocation2 + $0x268] sm:$0xff]  }
 0xa2f   :  { %3328 = vmatprep.mubr.msk.bf16.mxu1 %vm3685_vm0, %v3684_v0 }
 0xb01   :  { %v1795_v50 = vpop.f32.mrb[22].mxu1 }
 0xb02   :  { %v1799_v51 = vmul.f32 0.125, %v1795_v50  ;;  %v3294_v52 = vpop.f32.mrb[23].mxu1  ;;  %v3593_v50 = vld [vmem:[#allocation2 + $0x2f8] sm:$0xff]  }
 0xb04   :  { %v1800_v53 = vmul.f32 %v1799_v51, %v1799_v51 }
 0xb06   :  { %v1802_v54 = vrot.slane %v1800_v53, 7 }
 0xb08   :  { %v1804_v55 = vsub.f32 %v1799_v51, %v1802_v54 }
 0xb0a   :  { %v1805_v56 = vmax.f32 %v1804_v55, 0.0 }
 0xb0c   :  { %v1806_v57 = vadd.f32 1e-05, %v1805_v56 }
 0xb0e   :  { %3602 = vrsqrt.f32 %v1806_v57 }
 0xb18   :  { %v3603_v58 = vpop.eup %3602 }
 0xb19   :  { %v1809_v60 = vrot.slane %v3603_v58, 1 }
 0xb1b   :  { %v1811_v61 = vmul.f32 %v1809_v60, %v1712_v59 }
 0xb1d   :  { %v1812_v62 = vmul.f32 %v1811_v61, %v1799_v51 }
 0xb1f   :  { %v1814_v63 = vrot.slane %v1812_v62, 7 }
 0xb21   :  { %v1816_v1 = vsub.f32 %v1712_v59, %v1814_v63 }
 0xb23   :  { %v1817_v2 = vsel %vm413_vm4, %v1811_v61, %v1816_v1 }
 0xb24   :  { %3312 = vmatmul.mubr.msk.f32.vlgmr.msra.gmra.mrb[26].mxu0 %vm271_vm2, %v1817_v2 }
 0xb25   :  { %3316 = vmatprep.mubr.msk.bf16.mxu0 %vm3685_vm0, %v3684_v0 }
 0xbf7   :  { %v1887_v3 = vpop.f32.mrb[26].mxu0 }
 0xbf8   :  { %v1894_v4 = vrot.slane %v1887_v3, %v3804_v39  ;;  %v3313_v5 = vpop.f32.mrb[27].mxu0  ;;  %v1899_v7 = vrot.slane %v1887_v3, %v3806_v40 }
 0xbfa   :  { %v1895_v6 = vmul.f32 %v1894_v4, %v1683_v18  ;;  %v3566_v18 = vld [vmem:[#allocation2 + $0x290] sm:$0xff]  }
 0xbfc   :  { %v1900_v8 = vadd.f32 %v1899_v7, %v1895_v6 }
 0xbfe   :  { %v1901_v9 = vmax.f32 %v1900_v8, 0.0  ;;  %v2424_v8 = vld [vmem:[#allocation5 + $0x1c0] sm:$0xff] }
 0xc00   :  { %v1902_v10 = vpack.c.bf16 %v1901_v9, %v1901_v9  ;;  %v2425_v9 = vld [vmem:[#allocation5 + $0x1c8] sm:$0xff] }
 0xc02   :  { %v1910_v12 = vsel %vm1908_vm8, %v1902_v10, 0  ;;  %v3467_v10 = vpack.c.bf16 %v2425_v9, %v2424_v8  ;;  %v2440_v9 = vld [vmem:[#allocation5 + $0x240] sm:$0x3] }
 0xc03   :  { %3315 = vmatpush3.bf16.msra.mxu0 %v1910_v12  ;;  %3327 = vmatpush3.bf16.msra.mxu1 %v1910_v12 }
 0xc04   :  { %3320 = vmatprep.subr.bf16.mxu0 %v3684_v0  ;;  %3023 = vmatprep.subr.bf16.mxu1 %v3562_v11  ;;  %v2426_v11 = vld [vmem:[#allocation5 + $0x1d0] sm:$0xff] }
 0xc06   :  { %3317 = vmatmul.mubr.msk.bf16.vlgmr.msra.gmra.mrb[40].mxu0 %vm1904_vm9, %v1903_v13  ;;  %3329 = vmatmul.mubr.msk.bf16.vlgmr.msra.gmra.mrb[36].mxu1 %vm1904_vm9, %v1998_v14  ;;  %v2428_v14 = vld [vmem:[#allocation5 + $0x1e0] sm:$0xff] }
 0xc07   :  { %3321 = vmatpush3.bf16.msra.mxu0 %v1910_v12  ;;  %3322 = vmatprep.mubr.msk.bf16.mxu0 %vm3685_vm0, %v3684_v0 }
 0xc08   :  { %3332 = vmatprep.subr.bf16.mxu0 %v3684_v0  ;;  %3024 = vmatpush3.bf16.msra.mxu1 %v3563_v15  ;;  %v2429_v15 = vld [vmem:[#allocation5 + $0x1e8] sm:$0xff] }
 0xc09   :  { %3025 = vmatprep.subr.bf16.mxu1 %v3564_v16  ;;  %v3473_v16 = vpack.c.bf16 %v2429_v15, %v2428_v14  ;;  %v3595_v15 = vld [vmem:[#allocation2 + $0x348] sm:$0xff]  }
 0xc0c   :  { %3026 = vmatpush3.bf16.msra.mxu1 %v3565_v17  ;;  %v2430_v17 = vld [vmem:[#allocation5 + $0x1f0] sm:$0xff] }
 0xc0d   :  { %3027 = vmatprep.subr.bf16.mxu1 %v3566_v18  ;;  %v2431_v18 = vld [vmem:[#allocation5 + $0x1f8] sm:$0xff] }
 0xc0e   :  { %3323 = vmatmul.mubr.msk.bf16.vlgmr.msra.gmra.mrb[44].mxu0 %vm1904_vm9, %v1953_v19  ;;  %v3476_v19 = vpack.c.bf16 %v2431_v18, %v2430_v17  ;;  %v3597_v17 = vld [vmem:[#allocation2 + $0x358] sm:$0xff]  }
 0xc0f   :  { %3333 = vmatpush3.bf16.msra.mxu0 %v1910_v12  ;;  %3334 = vmatprep.mubr.msk.bf16.mxu0 %vm3685_vm0, %v3684_v0  ;;  %v2427_v12 = vld [vmem:[#allocation5 + $0x1d8] sm:$0xff] }
 0xc10   :  { %3045 = vmatprep.subr.bf16.mxu0 %v3567_v20  ;;  %3028 = vmatpush3.bf16.msra.mxu1 %v3568_v21  ;;  %v3470_v13 = vpack.c.bf16 %v2427_v12, %v2426_v11 }
 0xc11   :  { %3029 = vmatprep.subr.bf16.mxu1 %v3570_v22 }
 0xc14   :  { %3030 = vmatpush3.bf16.msra.mxu1 %v3572_v23 }
 0xc15   :  { %3031 = vmatprep.subr.bf16.mxu1 %v3574_v24 }
 0xc16   :  { %3335 = vmatmul.mubr.msk.bf16.vlgmr.msra.gmra.mrb[48].mxu0 %vm1904_vm9, %v2043_v25 }
 0xc17   :  { %3046 = vmatpush3.bf16.msra.mxu0 %v3569_v26 }
 0xc18   :  { %3047 = vmatprep.subr.bf16.mxu0 %v3571_v27  ;;  %3032 = vmatpush3.bf16.msra.mxu1 %v3576_v28 }
 0xc19   :  { %3033 = vmatprep.subr.bf16.mxu1 %v3578_v32 }
 0xc1b   :  { %3048 = vmatpush3.bf16.msra.mxu0 %v3573_v29 }
 0xc1c   :  { %3049 = vmatprep.subr.bf16.mxu0 %v3575_v30  ;;  %3034 = vmatpush3.bf16.msra.mxu1 %v3580_v34 }
 0xc1d   :  { %3035 = vmatprep.subr.bf16.mxu1 %v3582_v36 }
 0xc1f   :  { %3050 = vmatpush3.bf16.msra.mxu0 %v3577_v31 }
 0xc20   :  { %3051 = vmatprep.subr.bf16.mxu0 %v3579_v33  ;;  %3036 = vmatpush3.bf16.msra.mxu1 %v3584_v38 }
 0xc21   :  { %3037 = vmatprep.subr.bf16.mxu1 %v3586_v42 }
 0xc23   :  { %3052 = vmatpush3.bf16.msra.mxu0 %v3581_v35 }
 0xc24   :  { %3053 = vmatprep.subr.bf16.mxu0 %v3583_v37  ;;  %3038 = vmatpush3.bf16.msra.mxu1 %v3588_v44 }
 0xc25   :  { %3466 = vmatprep.subr.bf16.mxu1 %v3688_v48 }
 0xc27   :  { %3054 = vmatpush3.bf16.msra.mxu0 %v3585_v41 }
 0xc28   :  { %3055 = vmatprep.subr.bf16.mxu0 %v3587_v43 }
 0xc2b   :  { %3056 = vmatpush3.bf16.msra.mxu0 %v3589_v45 }
 0xc2c   :  { %3057 = vmatprep.subr.bf16.mxu0 %v3590_v46 }
 0xc2f   :  { %3058 = vmatpush3.bf16.msra.mxu0 %v3591_v47 }
 0xc30   :  { %3059 = vmatprep.subr.bf16.mxu0 %v3592_v49 }
 0xc33   :  { %3060 = vmatpush3.bf16.msra.mxu0 %v3593_v50  ;;  %v2432_v50 = vld [vmem:[#allocation5 + $0x200] sm:$0xff] }
 0xc34   :  { %3478 = vmatprep.subr.bf16.mxu0 %v3688_v48 }
 0xcd9   :  { %v1946_v51 = vpop.f32.mrb[40].mxu0  ;;  %v2036_v52 = vpop.f32.mrb[36].mxu1 }
 0xcda   :  { %v3318_v53 = vpop.f32.mrb[41].mxu0  ;;  %v3330_v54 = vpop.f32.mrb[37].mxu1  ;;  %v1952_v62 = vpack.c.bf16 %v1946_v51, %v1946_v51  ;;  %v2042_v2 = vpack.c.bf16 %v2036_v52, %v2036_v52  ;;  %v2433_v51 = vld [vmem:[#allocation5 + $0x208] sm:$0xff] }
 0xcdb   :  { %v1949_v55 = vpop.f32.mrb[42].mxu0  ;;  %v2039_v56 = vpop.f32.mrb[38].mxu1  ;;  %v3479_v52 = vpack.c.bf16 %v2433_v51, %v2432_v50  ;;  %v2434_v53 = vld [vmem:[#allocation5 + $0x210] sm:$0xff]  ;;  %v2435_v54 = vld [vmem:[#allocation5 + $0x218] sm:$0xff] }
 0xcdc   :  { %v3319_v57 = vpop.f32.mrb[43].mxu0  ;;  %v3331_v58 = vpop.f32.mrb[39].mxu1  ;;  %v3482_v55 = vpack.c.bf16 %v2435_v54, %v2434_v53  ;;  %v2436_v56 = vld [vmem:[#allocation5 + $0x220] sm:$0xff] }
 0xcdd   :  { %v2437_v57 = vld [vmem:[#allocation5 + $0x228] sm:$0xff] }
 0xcde   :  { %v3485_v58 = vpack.c.bf16 %v2437_v57, %v2436_v56 }
 0xce1   :  { %v1991_v59 = vpop.f32.mrb[44].mxu0 }
 0xce2   :  { %v1997_v60 = vpack.c.bf16 %v1991_v59, %v1991_v59  ;;  %v3324_v61 = vpop.f32.mrb[45].mxu0  ;;  %v2438_v59 = vld [vmem:[#allocation5 + $0x230] sm:$0xff] }
 0xce3   :  { %v1994_v63 = vpop.f32.mrb[46].mxu0 }
 0xce4   :  { %v3325_v1 = vpop.f32.mrb[47].mxu0  ;;  %2376 = vmatprep.mubr.bf16.mxu1 %v1997_v60  ;;  %v2439_v60 = vld [vmem:[#allocation5 + $0x238] sm:$0xff] }
 0xce5   :  { %2377 = vmatmul.mubr.bf16.vlgmr.msra.gmra.mrb[40].mxu1 %v1952_v62  ;;  %v3488_v61 = vpack.c.bf16 %v2439_v60, %v2438_v59  ;;  %v3594_v62 = vld [vmem:[#allocation2 + $0x340] sm:$0xff]  }
 0xce6   :  { %3354 = vmatprep.mubr.msk.f32.mxu1 %vm3685_vm0, %v3684_v0  ;;  %3468 = vmatpush3.bf16.msra.mxu1 %v3467_v10 }
 0xce7   :  { %3469 = vmatprep.subr.bf16.mxu1 %v3688_v48 }
 0xce9   :  { %v2081_v3 = vpop.f32.mrb[48].mxu0 }
 0xcea   :  { %v2087_v4 = vpack.c.bf16 %v2081_v3, %v2081_v3  ;;  %v3336_v5 = vpop.f32.mrb[49].mxu0  ;;  %3471 = vmatpush3.bf16.msra.mxu1 %v3470_v13 }
 0xceb   :  { %v2084_v6 = vpop.f32.mrb[50].mxu0  ;;  %3472 = vmatprep.subr.bf16.mxu1 %v3688_v48 }
 0xcec   :  { %v3337_v7 = vpop.f32.mrb[51].mxu0  ;;  %2416 = vmatprep.mubr.bf16.mxu0 %v2087_v4 }
 0xced   :  { %2417 = vmatmul.mubr.bf16.vlgmr.msra.gmra.mrb[52].mxu0 %v2042_v2 }
 0xcee   :  { %3373 = vmatprep.mubr.msk.f32.mxu0 %vm3685_vm0, %v3684_v0  ;;  %3474 = vmatpush3.bf16.msra.mxu1 %v3473_v16  ;;  %v3596_v16 = vld [vmem:[#allocation2 + $0x350] sm:$0xff]  }
 0xcef   :  { %3475 = vmatprep.subr.bf16.mxu1 %v3688_v48  ;;  %3480 = vmatpush3.bf16.msra.mxu0 %v3479_v52 }
 0xcf0   :  { %3481 = vmatprep.subr.bf16.mxu0 %v3688_v48 }
 0xcf2   :  { %3477 = vmatpush3.bf16.msra.mxu1 %v3476_v19 }
 0xcf3   :  { %3376 = vmatprep.subr.bf16.mxu1 %v3684_v0  ;;  %3483 = vmatpush3.bf16.msra.mxu0 %v3482_v55 }
 0xcf4   :  { %3484 = vmatprep.subr.bf16.mxu0 %v3688_v48 }
 0xcf7   :  { %3486 = vmatpush3.bf16.msra.mxu0 %v3485_v58 }
 0xcf8   :  { %3487 = vmatprep.subr.bf16.mxu0 %v3688_v48 }
 0xcfb   :  { %3489 = vmatpush3.bf16.msra.mxu0 %v3488_v61 }
 0xdb8   :  { %v3039_v20 = vpop.f32.mrb[40].mxu1 }
 0xdb9   :  { %v3040_v21 = vpop.f32.mrb[41].mxu1 }
 0xdba   :  { %v3041_v22 = vadd.f32 %v3040_v21, %v3039_v20  ;;  %v3042_v23 = vpop.f32.mrb[42].mxu1 }
 0xdbb   :  { %v3043_v24 = vpop.f32.mrb[43].mxu1 }
 0xdc0   :  { %v3061_v25 = vpop.f32.mrb[52].mxu0 }
 0xdc1   :  { %v3062_v26 = vpop.f32.mrb[53].mxu0 }
 0xdc2   :  { %v3063_v27 = vadd.f32 %v3062_v26, %v3061_v25  ;;  %v3064_v28 = vpop.f32.mrb[54].mxu0  ;;  %v2847_v26 = vld [vmem:[#allocation5 + $0x248] ss:$0 sm:$0xff] }
 0xdc3   :  { %v3065_v29 = vpop.f32.mrb[55].mxu0 }
 0xdc4   :  { %v3905_v30 = vadd.f32 %v3063_v27, %v3041_v22 }
 0xdc6   :  { %v2442_v31 = vsel %vm2441_vm10, %v3905_v30, 0.0  ;;  %v2449_v32 = vmul.f32 %v3905_v30, %v3905_v30 }
 0xdc7   :  { %v2443_v33 = vrot.slane %v2442_v31, 4 }
 0xdc8   :  { %v2450_v34 = vsel %vm2441_vm10, %v2449_v32, 0.0 }
 0xdc9   :  { %v2444_v35 = vadd.f32 %v2443_v33, %v2442_v31  ;;  %v2451_v36 = vrot.slane %v2450_v34, 4 }
 0xdcb   :  { %v2445_v37 = vrot.slane %v2444_v35, 2  ;;  %v2452_v38 = vadd.f32 %v2451_v36, %v2450_v34 }
 0xdcd   :  { %v2446_v41 = vadd.f32 %v2445_v37, %v2444_v35  ;;  %v2453_v42 = vrot.slane %v2452_v38, 2 }
 0xdcf   :  { %v2447_v43 = vrot.slane %v2446_v41, 1  ;;  %v2454_v44 = vadd.f32 %v2453_v42, %v2452_v38 }
 0xdd1   :  { %v2455_v45 = vrot.slane %v2454_v44, 1  ;;  %v2448_v46 = vadd.f32 %v2447_v43, %v2446_v41 }
 0xdd3   :  { %v2456_v47 = vadd.f32 %v2455_v45, %v2454_v44 }
 0xdd5   :  { %v2457_v49 = vsel %vm413_vm4, %v2448_v46, %v2456_v47 }
 0xdd6   :  { %3355 = vmatmul.mubr.msk.f32.vlgmr.msra.gmra.mrb[44].mxu1 %vm271_vm2, %v2457_v49 }
 0xdd7   :  { %3384 = vmatprep.mubr.msk.bf16.mxu1 %vm3685_vm0, %v3684_v0  ;;  %3377 = vmatpush3.bf16.msra.mxu1 %v3594_v62 }
 0xdd8   :  { %3378 = vmatprep.subr.bf16.mxu1 %v3684_v0 }
 0xddb   :  { %3379 = vmatpush3.bf16.msra.mxu1 %v3595_v15 }
 0xddc   :  { %3380 = vmatprep.subr.bf16.mxu1 %v3684_v0 }
 0xddf   :  { %3381 = vmatpush3.bf16.msra.mxu1 %v3596_v16 }
 0xde0   :  { %3382 = vmatprep.subr.bf16.mxu1 %v3684_v0 }
 0xde3   :  { %3383 = vmatpush3.bf16.msra.mxu1 %v3597_v17 }
 0xea9   :  { %v2527_v63 = vpop.f32.mrb[44].mxu1 }
 0xeaa   :  { %v2531_v1 = vmul.f32 0.5, %v2527_v63  ;;  %v3356_v2 = vpop.f32.mrb[45].mxu1 }
 0xeac   :  { %v2532_v3 = vmul.f32 %v2531_v1, %v2531_v1 }
 0xeae   :  { %v2534_v4 = vrot.slane %v2532_v3, 7 }
 0xeb0   :  { %v2536_v5 = vsub.f32 %v2531_v1, %v2534_v4 }
 0xeb2   :  { %v2537_v6 = vmax.f32 %v2536_v5, 0.0 }
 0xeb4   :  { %v2538_v7 = vadd.f32 1e-05, %v2537_v6 }
 0xeb6   :  { %3604 = vrsqrt.f32 %v2538_v7 }
 0xec0   :  { %v3605_v8 = vpop.eup %3604 }
 0xec1   :  { %v2541_v48 = vrot.slane %v3605_v8, 1 }
 0xec3   :  { %v2543_v10 = vmul.f32 %v2541_v48, %v2440_v9 }
 0xec5   :  { %v2544_v11 = vmul.f32 %v2543_v10, %v2531_v1 }
 0xec7   :  { %v2546_v12 = vrot.slane %v2544_v11, 7 }
 0xec9   :  { %v2548_v13 = vsub.f32 %v2440_v9, %v2546_v12 }
 0xecb   :  { %v2549_v14 = vsel %vm413_vm4, %v2543_v10, %v2548_v13 }
 0xecc   :  { %3374 = vmatmul.mubr.msk.f32.vlgmr.msra.gmra.mrb[56].mxu0 %vm271_vm2, %v2549_v14 }
 0xf9f   :  { %v2619_v18 = vpop.f32.mrb[56].mxu0 }
 0xfa0   :  { %v2626_v19 = vrot.slane %v2619_v18, %v3804_v39  ;;  %v3375_v20 = vpop.f32.mrb[57].mxu0  ;;  %v2631_v22 = vrot.slane %v2619_v18, %v3806_v40 }
 0xfa2   :  { %v2627_v21 = vmul.f32 %v2626_v19, %v3905_v30 }
 0xfa4   :  { %v2632_v23 = vadd.f32 %v2631_v22, %v2627_v21 }
 0xfa6   :  { %v2633_v24 = vmax.f32 %v2632_v23, 0.0 }
 0xfa8   :  { %v2634_v25 = vpack.c.bf16 %v2633_v24, %v2633_v24 }
 0xfaa   :  { %3385 = vmatmul.mubr.msk.bf16.vlgmr.msra.gmra.mrb[48].mxu1 %vm271_vm2, %v2634_v25 }
0x107d   :  { %v2709_v27 = vpop.f32.mrb[48].mxu1 }
0x107e   :  { %v2710_v0 = vadd.f32 %v2847_v26, %v2709_v27  ;;  %v3386_v28 = vpop.f32.mrb[49].mxu1 }
0x107f   :  { %v2712_v29 = vpop.f32.mrb[50].mxu1 }
0x1080   :  { %v3387_v39 = vpop.f32.mrb[51].mxu1  ;;  %2716 = vst.msk [vmem:[#allocation7] sm:$0x3] %vm2715_vm11, %v2710_v0 }
0x1081   :  { %3661 = shalt.err (!%p3658_p6)
}
0x1082   :  { %s3662_s25 = scalar_lea.hbm %s3941_s3, 32 }
0x1083   :  { %p3663_p7 = scmp.ne.s32.totalorder %s3941_s3, %s3662_s25  ;;  %p3666_p8 = scmp.lt.u32.totalorder %s3662_s25, %s3941_s3 }
0x1085   :  { %p3668_p9 = pnand %p3666_p8, %p3663_p7 }
0x1087   :  { %3671 = shalt.err (!%p3668_p9)
}
0x1088   :  { %2726 = dma.vmem_to_hbm [thread:$0]  %s2724_s21, 32, %s3941_s3, [#allocation4]  }
0x1089   :  { %3676 = dma.done.wait [#allocation4], 32  }
0x108a   :  { %3677 = vsyncadd [#allocation4], 4294967264 }
0x108b   :  { %2730 = vsyncpa [#allocation3], 1 }
0x108c   :  { %2731 = vsyncpa [#allocation6], 1 }
0x108d   :  { %2732 = vsyncpa [#allocation4], 1 }

</bundles_post_ra>
